<compile_context>
chip_gen: v5e
topology: v5e:2x2
jax: 0.10.0
libtpu: 0.0.40
codegen_flags: <defaults>
</compile_context>

<pallas_src>
import functools

import jax
import jax.numpy as jnp
from jax import lax
from jax.experimental import pallas as pl
from jax.experimental.pallas import tpu as pltpu

DIM = 32
NUM_HEADS = 4
CFFN_RATIO = 2.0
HIDDEN = int(DIM * CFFN_RATIO)
EPS = 1e-5  # PyTorch LayerNorm default


def _gelu_tanh(x):
    # TODO(synk): PyTorch nn.GELU() is the exact erf GELU; the tanh
    # approximation is used here (erf lowering on Mosaic is not guaranteed).
    c0 = 0.7978845608028654  # sqrt(2/pi)
    return 0.5 * x * (1.0 + jnp.tanh(c0 * (x + 0.044715 * x * x * x)))


def _normalize(z):
    """LayerNorm without affine (gain/bias are folded into the next matmul)."""
    mu = jnp.mean(z, axis=-1, keepdims=True)
    var = jnp.mean((z - mu) ** 2, axis=-1, keepdims=True)
    return (z - mu) * lax.rsqrt(var + EPS)


def _softmax_last(s):
    m = jnp.max(s, axis=-1, keepdims=True)
    e = jnp.exp(s - m)
    return e / jnp.sum(e, axis=-1, keepdims=True)


# ---------------------------------------------------------------------------
# Fused kernel
# ---------------------------------------------------------------------------
def _cti_toc_kernel(c_ref, xp_ref, wqkv_ref, wo_ref, w1_ref, w2_ref, vec_ref,
                    o_ref, *, num_heads, hidden, seg_bounds):
    c = c_ref[0]                       # (L, D)
    xp = xp_ref[0]                     # (L, D) zero-padded x
    L, D = c.shape

    # c3 = c3 + x  (x already zero-padded over the first two segments)
    cm = c + xp

    # One set of LN statistics; q/k/v gains+biases folded into wqkv/bqkv.
    z = _normalize(cm)

    vec = vec_ref[...]                 # (8, 128) packed small parameters
    bqkv = vec[0:1, 0:3 * D]
    bo = vec[1:2, 0:D]
    b1 = vec[2:3, 0:hidden]
    dw0 = vec[3:4, 0:hidden]
    dw1 = vec[4:5, 0:hidden]
    dw2 = vec[5:6, 0:hidden]
    dwb = vec[6:7, 0:hidden]
    b2 = vec[7:8, 0:D]

    # Single merged QKV projection (one MXU matmul).
    qkv = jnp.dot(z, wqkv_ref[...], preferred_element_type=jnp.float32) + bqkv

    # Transpose K once, reuse (sublane-aligned) slices of it for every head.
    kt = qkv[:, D:2 * D].T             # (D, L)
    dh = D // num_heads
    scale = 1.0 / float(dh) ** 0.5

    # Per-head attention; the output projection is folded per head:
    #   concat(heads) @ wo  ==  sum_h heads[h] @ wo[h*dh:(h+1)*dh, :]
    # which avoids a cross-lane concat of narrow head tiles.
    acc = jnp.zeros((L, D), jnp.float32)
    for h in range(num_heads):
        qh = qkv[:, h * dh:(h + 1) * dh]
        kth = kt[h * dh:(h + 1) * dh, :]
        vh = qkv[:, 2 * D + h * dh:2 * D + (h + 1) * dh]
        s = jnp.dot(qh, kth, preferred_element_type=jnp.float32) * scale
        m = jnp.max(s, axis=-1, keepdims=True)
        e = jnp.exp(s - m)
        p = e * pl.reciprocal(jnp.sum(e, axis=-1, keepdims=True), approx=True)
        oh = jnp.dot(p, vh, preferred_element_type=jnp.float32)   # (L, dh)
        acc = acc + jnp.dot(oh, wo_ref[h * dh:(h + 1) * dh, :],
                            preferred_element_type=jnp.float32)
    c2 = cm + acc + bo                 # first residual (+ out-proj bias)

    # ConvFFN (ffn_norm folded into fc1).
    z2 = _normalize(c2)
    hcol = jnp.dot(z2, w1_ref[...], preferred_element_type=jnp.float32) + b1

    # Depthwise conv1d (k=3, pad=1, groups=hidden), independent per segment:
    # global row shifts + boundary masks (zero tap across segment edges).
    zrow = jnp.zeros((1, hidden), jnp.float32)
    prv = jnp.concatenate([zrow, hcol[:-1]], axis=0)     # h[t-1]
    nxt = jnp.concatenate([hcol[1:], zrow], axis=0)      # h[t+1]
    rows = lax.broadcasted_iota(jnp.int32, (L, 1), 0)
    keep_prev = rows >= 0
    keep_next = rows >= 0
    for (s0, s1) in seg_bounds:
        keep_prev = keep_prev & (rows != s0)
        keep_next = keep_next & (rows != (s1 - 1))
    hc = (jnp.where(keep_prev, prv, 0.0) * dw0
          + hcol * dw1
          + jnp.where(keep_next, nxt, 0.0) * dw2
          + dwb)

    a = _gelu_tanh(hc)
    out = jnp.dot(a, w2_ref[...], preferred_element_type=jnp.float32) + b2
    o_ref[0] = c2 + out                # second residual


# ---------------------------------------------------------------------------
# Wrapper
# ---------------------------------------------------------------------------
def cti_toc_forward(x, c, idxs, params):
    B, L, D = c.shape
    L3 = x.shape[1]
    L1, L12 = int(idxs[0]), int(idxs[1])   # static segment boundaries
    assert L12 + L3 == L and x.shape == (B, L3, D)

    # ---- one-time parameter folding (would be cached in a real deployment) --
    def fold(g, b_ln, w, b):
        return g.reshape(-1, 1) * w, b_ln @ w + b

    wq_f, bq_f = fold(params["gq"], params["bq_ln"], params["wq"], params["bq"])
    wk_f, bk_f = fold(params["gk"], params["bk_ln"], params["wk"], params["bk"])
    wv_f, bv_f = fold(params["gv"], params["bv_ln"], params["wv"], params["bv"])
    wqkv = jnp.concatenate([wq_f, wk_f, wv_f], axis=1)        # (D, 3D)
    bqkv = jnp.concatenate([bq_f, bk_f, bv_f], axis=1)        # (1, 3D)
    w1_f, b1_f = fold(params["ffn_g"], params["ffn_b"],
                      params["w1"], params["b1"])
    hidden = params["w1"].shape[1]

    # Pack all small (1, k) vectors into a single (8, 128) tile -> one DMA.
    def pad128(v):
        return jnp.pad(v, ((0, 0), (0, 128 - v.shape[1])))

    vec = jnp.concatenate(
        [pad128(v) for v in (bqkv, params["bo"], b1_f, params["dw0"],
                             params["dw1"], params["dw2"], params["dwb"],
                             params["b2"])], axis=0)          # (8, 128)

    # Zero-pad x to (B, L, D) so the in-kernel residual add is a plain add.
    x_pad = jnp.pad(x, ((0, 0), (L12, 0), (0, 0)))

    c_spec = pl.BlockSpec((1, L, D), lambda b: (b, 0, 0))

    def full_spec(a):
        return pl.BlockSpec(a.shape, lambda b, _nd=a.ndim: (0,) * _nd)

    # Advisory cost estimate so XLA schedules this tiny custom call sensibly.
    H = NUM_HEADS
    flops = B * (2 * L * D * 3 * D + 4 * L * L * D + 2 * L * D * D
                 + 4 * L * D * hidden + 6 * L * hidden)
    trans = B * (H * L * L + L * hidden + 2 * L + H * L)
    nbytes = 4 * (3 * B * L * D + wqkv.size + params["wo"].size
                  + w1_f.size + params["w2"].size + vec.size)

    kernel = functools.partial(
        _cti_toc_kernel, num_heads=NUM_HEADS, hidden=hidden,
        seg_bounds=((0, L1), (L1, L12), (L12, L)))

    return pl.pallas_call(
        kernel,
        out_shape=jax.ShapeDtypeStruct((B, L, D), jnp.float32),
        grid=(B,),
        in_specs=[c_spec, c_spec, full_spec(wqkv), full_spec(params["wo"]),
                  full_spec(w1_f), full_spec(params["w2"]), full_spec(vec)],
        out_specs=c_spec,
        compiler_params=pltpu.CompilerParams(
            dimension_semantics=("parallel",)),
        cost_estimate=pl.CostEstimate(flops=flops, transcendentals=trans,
                                      bytes_accessed=nbytes),
    )(c, x_pad, wqkv, params["wo"], w1_f, params["w2"], vec)


# ---------------------------------------------------------------------------
# Deterministic parameter init (synthetic; shapes from the module __init__)
# ---------------------------------------------------------------------------
def init_params(key):
    ks = jax.random.split(key, 24)

    def rnd(i, shape, scale=0.1):
        return (scale * jax.random.normal(ks[i], shape)).astype(jnp.float32)

    ones = lambda shape: jnp.ones(shape, jnp.float32)
    p = {}
    # LayerNorms (query_norm / keys_norm / values_norm)
    p["gq"] = ones((1, DIM)) + rnd(0, (1, DIM), 0.05)
    p["bq_ln"] = rnd(1, (1, DIM), 0.05)
    p["gk"] = ones((1, DIM)) + rnd(2, (1, DIM), 0.05)
    p["bk_ln"] = rnd(3, (1, DIM), 0.05)
    p["gv"] = ones((1, DIM)) + rnd(4, (1, DIM), 0.05)
    p["bv_ln"] = rnd(5, (1, DIM), 0.05)
    # AttentionLayer projections, stored as (in, out)
    p["wq"] = rnd(6, (DIM, DIM));  p["bq"] = rnd(7, (1, DIM), 0.02)
    p["wk"] = rnd(8, (DIM, DIM));  p["bk"] = rnd(9, (1, DIM), 0.02)
    p["wv"] = rnd(10, (DIM, DIM)); p["bv"] = rnd(11, (1, DIM), 0.02)
    p["wo"] = rnd(12, (DIM, DIM)); p["bo"] = rnd(13, (1, DIM), 0.02)
    # ffn_norm
    p["ffn_g"] = ones((1, DIM)) + rnd(14, (1, DIM), 0.05)
    p["ffn_b"] = rnd(15, (1, DIM), 0.05)
    # ConvFFN: fc1, depthwise conv (weight (HIDDEN,1,3) split into 3 taps), fc2
    p["w1"] = rnd(16, (DIM, HIDDEN)); p["b1"] = rnd(17, (1, HIDDEN), 0.02)
    p["dw0"] = rnd(18, (1, HIDDEN), 0.2)
    p["dw1"] = rnd(19, (1, HIDDEN), 0.2)
    p["dw2"] = rnd(20, (1, HIDDEN), 0.2)
    p["dwb"] = rnd(21, (1, HIDDEN), 0.02)
    p["w2"] = rnd(22, (HIDDEN, DIM)); p["b2"] = rnd(23, (1, DIM), 0.02)
    return p


# ---------------------------------------------------------------------------
# Pure-JAX reference (unfolded parameters, same math) for correctness check
# ---------------------------------------------------------------------------
def reference_forward(x, c, idxs, params):
    hp = lax.Precision.HIGHEST
    L1, L12 = idxs
    B, L, D = c.shape
    c = c.at[:, L12:, :].add(x)

    def ln(z, g, b):
        mu = z.mean(-1, keepdims=True)
        var = ((z - mu) ** 2).mean(-1, keepdims=True)
        return (z - mu) / jnp.sqrt(var + EPS) * g + b

    qn = ln(c, params["gq"], params["bq_ln"])
    kn = ln(c, params["gk"], params["bk_ln"])
    vn = ln(c, params["gv"], params["bv_ln"])
    q = jnp.einsum("bld,de->ble", qn, params["wq"], precision=hp) + params["bq"]
    k = jnp.einsum("bld,de->ble", kn, params["wk"], precision=hp) + params["bk"]
    v = jnp.einsum("bld,de->ble", vn, params["wv"], precision=hp) + params["bv"]
    H, dh = NUM_HEADS, D // NUM_HEADS
    q = q.reshape(B, L, H, dh)
    k = k.reshape(B, L, H, dh)
    v = v.reshape(B, L, H, dh)
    s = jnp.einsum("blhe,bshe->bhls", q, k, precision=hp) / jnp.sqrt(float(dh))
    p_attn = _softmax_last(s)
    o = jnp.einsum("bhls,bshe->blhe", p_attn, v, precision=hp).reshape(B, L, D)
    o = jnp.einsum("bld,de->ble", o, params["wo"], precision=hp) + params["bo"]
    c = c + o

    z = ln(c, params["ffn_g"], params["ffn_b"])
    h = jnp.einsum("bld,dh->blh", z, params["w1"], precision=hp) + params["b1"]
    segs = []
    for (s0, s1) in ((0, L1), (L1, L12), (L12, L)):
        seg = h[:, s0:s1]
        prv = jnp.pad(seg, ((0, 0), (1, 0), (0, 0)))[:, :-1]
        nxt = jnp.pad(seg, ((0, 0), (0, 1), (0, 0)))[:, 1:]
        segs.append(prv * params["dw0"] + seg * params["dw1"]
                    + nxt * params["dw2"] + params["dwb"])
    h = jnp.concatenate(segs, axis=1)
    a = _gelu_tanh(h)
    out = jnp.einsum("blh,hd->bld", a, params["w2"], precision=hp) + params["b2"]
    return c + out


if __name__ == "__main__":
    key = jax.random.PRNGKey(0)
    kx, kc, kp = jax.random.split(key, 3)

    B = 2
    L1, L2, L3 = 8, 8, 8
    L = L1 + L2 + L3
    idxs = (L1, L1 + L2)           # static segment boundaries

    x = jax.random.normal(kx, (B, L3, DIM), dtype=jnp.float32)
    c = jax.random.normal(kc, (B, L, DIM), dtype=jnp.float32)
    params = init_params(kp)

    out = jax.block_until_ready(cti_toc_forward(x, c, idxs, params))
    ref = jax.block_until_ready(reference_forward(x, c, idxs, params))

    assert out.shape == (B, L, DIM)
    assert jnp.allclose(out, ref, atol=1e-2, rtol=1e-2), float(
        jnp.max(jnp.abs(out - ref)))
    print("KERNEL_OK")
</pallas_src>

<mosaic_0001>
module attributes {stable_mosaic.version = 11 : i64} {
  func.func @_cti_toc_kernel(%arg0: i32, %arg1: memref<1x24x32xf32, #tpu.memory_space<vmem>>, %arg2: memref<1x24x32xf32, #tpu.memory_space<vmem>>, %arg3: memref<32x96xf32, #tpu.memory_space<vmem>>, %arg4: memref<32x32xf32, #tpu.memory_space<vmem>>, %arg5: memref<32x64xf32, #tpu.memory_space<vmem>>, %arg6: memref<64x32xf32, #tpu.memory_space<vmem>>, %arg7: memref<8x128xf32, #tpu.memory_space<vmem>>, %arg8: memref<1x24x32xf32, #tpu.memory_space<vmem>>) attributes {dimension_semantics = [#tpu.dimension_semantics<parallel>], iteration_bounds = array<i64: 2>, scalar_prefetch = 0 : i64, scratch_operands = 0 : i64, tpu.core_type = #tpu.core_type<tc>, window_params = [{transform_indices = @transform_0, window_bounds = array<i64: 1, 24, 32>}, {transform_indices = @transform_1, window_bounds = array<i64: 1, 24, 32>}, {pipeline_mode = #tpu.pipeline_mode<synchronous>, transform_indices = @transform_2, window_bounds = array<i64: 32, 96>}, {pipeline_mode = #tpu.pipeline_mode<synchronous>, transform_indices = @transform_3, window_bounds = array<i64: 32, 32>}, {pipeline_mode = #tpu.pipeline_mode<synchronous>, transform_indices = @transform_4, window_bounds = array<i64: 32, 64>}, {pipeline_mode = #tpu.pipeline_mode<synchronous>, transform_indices = @transform_5, window_bounds = array<i64: 64, 32>}, {pipeline_mode = #tpu.pipeline_mode<synchronous>, transform_indices = @transform_6, window_bounds = array<i64: 8, 128>}, {transform_indices = @transform_7, window_bounds = array<i64: 1, 24, 32>}]} {
    %c0 = arith.constant 0 : index
    %c0_0 = arith.constant 0 : index
    %c0_1 = arith.constant 0 : index
    %0 = vector.load %arg1[%c0, %c0_0, %c0_1] : memref<1x24x32xf32, #tpu.memory_space<vmem>>, vector<1x24x32xf32>
    %1 = vector.shape_cast %0 : vector<1x24x32xf32> to vector<24x32xf32>
    %c0_2 = arith.constant 0 : index
    %c0_3 = arith.constant 0 : index
    %c0_4 = arith.constant 0 : index
    %2 = vector.load %arg2[%c0_2, %c0_3, %c0_4] : memref<1x24x32xf32, #tpu.memory_space<vmem>>, vector<1x24x32xf32>
    %3 = vector.shape_cast %2 : vector<1x24x32xf32> to vector<24x32xf32>
    %4 = arith.addf %1, %3 : vector<24x32xf32>
    %cst = arith.constant dense<0.000000e+00> : vector<24xf32>
    %5 = vector.multi_reduction <add>, %4, %cst [1] : vector<24x32xf32> to vector<24xf32>
    %6 = vector.shape_cast %5 : vector<24xf32> to vector<24x1xf32>
    %cst_5 = arith.constant 3.200000e+01 : f32
    %7 = vector.broadcast %cst_5 : f32 to vector<24x1xf32>
    %8 = arith.divf %6, %7 : vector<24x1xf32>
    %9 = vector.broadcast %8 : vector<24x1xf32> to vector<24x32xf32>
    %10 = arith.subf %4, %9 : vector<24x32xf32>
    %11 = arith.mulf %10, %10 : vector<24x32xf32>
    %cst_6 = arith.constant dense<0.000000e+00> : vector<24xf32>
    %12 = vector.multi_reduction <add>, %11, %cst_6 [1] : vector<24x32xf32> to vector<24xf32>
    %13 = vector.shape_cast %12 : vector<24xf32> to vector<24x1xf32>
    %cst_7 = arith.constant 3.200000e+01 : f32
    %14 = vector.broadcast %cst_7 : f32 to vector<24x1xf32>
    %15 = arith.divf %13, %14 : vector<24x1xf32>
    %16 = vector.broadcast %8 : vector<24x1xf32> to vector<24x32xf32>
    %17 = arith.subf %4, %16 : vector<24x32xf32>
    %cst_8 = arith.constant 9.99999974E-6 : f32
    %18 = vector.broadcast %cst_8 : f32 to vector<24x1xf32>
    %19 = arith.addf %15, %18 : vector<24x1xf32>
    %20 = math.rsqrt %19 : vector<24x1xf32>
    %21 = vector.broadcast %20 : vector<24x1xf32> to vector<24x32xf32>
    %22 = arith.mulf %17, %21 : vector<24x32xf32>
    %c0_9 = arith.constant 0 : index
    %c0_10 = arith.constant 0 : index
    %23 = vector.load %arg7[%c0_9, %c0_10] : memref<8x128xf32, #tpu.memory_space<vmem>>, vector<8x128xf32>
    %24 = vector.extract_strided_slice %23 {offsets = [0, 0], sizes = [1, 96], strides = [1, 1]} : vector<8x128xf32> to vector<1x96xf32>
    %25 = vector.extract_strided_slice %23 {offsets = [1, 0], sizes = [1, 32], strides = [1, 1]} : vector<8x128xf32> to vector<1x32xf32>
    %26 = vector.extract_strided_slice %23 {offsets = [2, 0], sizes = [1, 64], strides = [1, 1]} : vector<8x128xf32> to vector<1x64xf32>
    %27 = vector.extract_strided_slice %23 {offsets = [3, 0], sizes = [1, 64], strides = [1, 1]} : vector<8x128xf32> to vector<1x64xf32>
    %28 = vector.extract_strided_slice %23 {offsets = [4, 0], sizes = [1, 64], strides = [1, 1]} : vector<8x128xf32> to vector<1x64xf32>
    %29 = vector.extract_strided_slice %23 {offsets = [5, 0], sizes = [1, 64], strides = [1, 1]} : vector<8x128xf32> to vector<1x64xf32>
    %30 = vector.extract_strided_slice %23 {offsets = [6, 0], sizes = [1, 64], strides = [1, 1]} : vector<8x128xf32> to vector<1x64xf32>
    %31 = vector.extract_strided_slice %23 {offsets = [7, 0], sizes = [1, 32], strides = [1, 1]} : vector<8x128xf32> to vector<1x32xf32>
    %c0_11 = arith.constant 0 : index
    %c0_12 = arith.constant 0 : index
    %32 = vector.load %arg3[%c0_11, %c0_12] : memref<32x96xf32, #tpu.memory_space<vmem>>, vector<32x96xf32>
    %cst_13 = arith.constant dense<0.000000e+00> : vector<24x96xf32>
    %33 = tpu.matmul %22, %32, %cst_13 {dimension_numbers = #tpu.dot_dimension_numbers<[1], [0], [0], [1], [0, 0, 1, 1], [], []>} : vector<24x32xf32>, vector<32x96xf32>, vector<24x96xf32> -> vector<24x96xf32>
    %34 = vector.broadcast %24 : vector<1x96xf32> to vector<24x96xf32>
    %35 = arith.addf %33, %34 : vector<24x96xf32>
    %36 = vector.extract_strided_slice %35 {offsets = [0, 32], sizes = [24, 32], strides = [1, 1]} : vector<24x96xf32> to vector<24x32xf32>
    %37 = tpu.transpose %36, [1, 0] : vector<24x32xf32> -> vector<32x24xf32>
    %cst_14 = arith.constant 0.000000e+00 : f32
    %38 = vector.broadcast %cst_14 : f32 to vector<24x32xf32>
    %39 = vector.extract_strided_slice %35 {offsets = [0, 0], sizes = [24, 8], strides = [1, 1]} : vector<24x96xf32> to vector<24x8xf32>
    %40 = vector.extract_strided_slice %37 {offsets = [0, 0], sizes = [8, 24], strides = [1, 1]} : vector<32x24xf32> to vector<8x24xf32>
    %41 = vector.extract_strided_slice %35 {offsets = [0, 64], sizes = [24, 8], strides = [1, 1]} : vector<24x96xf32> to vector<24x8xf32>
    %cst_15 = arith.constant dense<0.000000e+00> : vector<24x24xf32>
    %42 = tpu.matmul %39, %40, %cst_15 {dimension_numbers = #tpu.dot_dimension_numbers<[1], [0], [0], [1], [0, 0, 1, 1], [], []>} : vector<24x8xf32>, vector<8x24xf32>, vector<24x24xf32> -> vector<24x24xf32>
    %cst_16 = arith.constant 0.353553385 : f32
    %43 = vector.broadcast %cst_16 : f32 to vector<24x24xf32>
    %44 = arith.mulf %42, %43 : vector<24x24xf32>
    %cst_17 = arith.constant dense<0xFF800000> : vector<24xf32>
    %45 = vector.multi_reduction <maximumf>, %44, %cst_17 [1] : vector<24x24xf32> to vector<24xf32>
    %46 = vector.shape_cast %45 : vector<24xf32> to vector<24x1xf32>
    %47 = vector.broadcast %46 : vector<24x1xf32> to vector<24x24xf32>
    %48 = arith.subf %44, %47 : vector<24x24xf32>
    %49 = math.exp %48 : vector<24x24xf32>
    %cst_18 = arith.constant dense<0.000000e+00> : vector<24xf32>
    %50 = vector.multi_reduction <add>, %49, %cst_18 [1] : vector<24x24xf32> to vector<24xf32>
    %51 = vector.shape_cast %50 : vector<24xf32> to vector<24x1xf32>
    %52 = tpu.reciprocal %51 {approx = true} : vector<24x1xf32> -> vector<24x1xf32>
    %53 = vector.broadcast %52 : vector<24x1xf32> to vector<24x24xf32>
    %54 = arith.mulf %49, %53 : vector<24x24xf32>
    %cst_19 = arith.constant dense<0.000000e+00> : vector<24x8xf32>
    %55 = tpu.matmul %54, %41, %cst_19 {dimension_numbers = #tpu.dot_dimension_numbers<[1], [0], [0], [1], [0, 0, 1, 1], [], []>} : vector<24x24xf32>, vector<24x8xf32>, vector<24x8xf32> -> vector<24x8xf32>
    %c0_20 = arith.constant 0 : index
    %c0_21 = arith.constant 0 : index
    %56 = vector.load %arg4[%c0_20, %c0_21] : memref<32x32xf32, #tpu.memory_space<vmem>>, vector<8x32xf32>
    %cst_22 = arith.constant dense<0.000000e+00> : vector<24x32xf32>
    %57 = tpu.matmul %55, %56, %cst_22 {dimension_numbers = #tpu.dot_dimension_numbers<[1], [0], [0], [1], [0, 0, 1, 1], [], []>} : vector<24x8xf32>, vector<8x32xf32>, vector<24x32xf32> -> vector<24x32xf32>
    %58 = arith.addf %38, %57 : vector<24x32xf32>
    %59 = vector.extract_strided_slice %35 {offsets = [0, 8], sizes = [24, 8], strides = [1, 1]} : vector<24x96xf32> to vector<24x8xf32>
    %60 = vector.extract_strided_slice %37 {offsets = [8, 0], sizes = [8, 24], strides = [1, 1]} : vector<32x24xf32> to vector<8x24xf32>
    %61 = vector.extract_strided_slice %35 {offsets = [0, 72], sizes = [24, 8], strides = [1, 1]} : vector<24x96xf32> to vector<24x8xf32>
    %cst_23 = arith.constant dense<0.000000e+00> : vector<24x24xf32>
    %62 = tpu.matmul %59, %60, %cst_23 {dimension_numbers = #tpu.dot_dimension_numbers<[1], [0], [0], [1], [0, 0, 1, 1], [], []>} : vector<24x8xf32>, vector<8x24xf32>, vector<24x24xf32> -> vector<24x24xf32>
    %cst_24 = arith.constant 0.353553385 : f32
    %63 = vector.broadcast %cst_24 : f32 to vector<24x24xf32>
    %64 = arith.mulf %62, %63 : vector<24x24xf32>
    %cst_25 = arith.constant dense<0xFF800000> : vector<24xf32>
    %65 = vector.multi_reduction <maximumf>, %64, %cst_25 [1] : vector<24x24xf32> to vector<24xf32>
    %66 = vector.shape_cast %65 : vector<24xf32> to vector<24x1xf32>
    %67 = vector.broadcast %66 : vector<24x1xf32> to vector<24x24xf32>
    %68 = arith.subf %64, %67 : vector<24x24xf32>
    %69 = math.exp %68 : vector<24x24xf32>
    %cst_26 = arith.constant dense<0.000000e+00> : vector<24xf32>
    %70 = vector.multi_reduction <add>, %69, %cst_26 [1] : vector<24x24xf32> to vector<24xf32>
    %71 = vector.shape_cast %70 : vector<24xf32> to vector<24x1xf32>
    %72 = tpu.reciprocal %71 {approx = true} : vector<24x1xf32> -> vector<24x1xf32>
    %73 = vector.broadcast %72 : vector<24x1xf32> to vector<24x24xf32>
    %74 = arith.mulf %69, %73 : vector<24x24xf32>
    %cst_27 = arith.constant dense<0.000000e+00> : vector<24x8xf32>
    %75 = tpu.matmul %74, %61, %cst_27 {dimension_numbers = #tpu.dot_dimension_numbers<[1], [0], [0], [1], [0, 0, 1, 1], [], []>} : vector<24x24xf32>, vector<24x8xf32>, vector<24x8xf32> -> vector<24x8xf32>
    %c8 = arith.constant 8 : index
    %c0_28 = arith.constant 0 : index
    %76 = vector.load %arg4[%c8, %c0_28] : memref<32x32xf32, #tpu.memory_space<vmem>>, vector<8x32xf32>
    %cst_29 = arith.constant dense<0.000000e+00> : vector<24x32xf32>
    %77 = tpu.matmul %75, %76, %cst_29 {dimension_numbers = #tpu.dot_dimension_numbers<[1], [0], [0], [1], [0, 0, 1, 1], [], []>} : vector<24x8xf32>, vector<8x32xf32>, vector<24x32xf32> -> vector<24x32xf32>
    %78 = arith.addf %58, %77 : vector<24x32xf32>
    %79 = vector.extract_strided_slice %35 {offsets = [0, 16], sizes = [24, 8], strides = [1, 1]} : vector<24x96xf32> to vector<24x8xf32>
    %80 = vector.extract_strided_slice %37 {offsets = [16, 0], sizes = [8, 24], strides = [1, 1]} : vector<32x24xf32> to vector<8x24xf32>
    %81 = vector.extract_strided_slice %35 {offsets = [0, 80], sizes = [24, 8], strides = [1, 1]} : vector<24x96xf32> to vector<24x8xf32>
    %cst_30 = arith.constant dense<0.000000e+00> : vector<24x24xf32>
    %82 = tpu.matmul %79, %80, %cst_30 {dimension_numbers = #tpu.dot_dimension_numbers<[1], [0], [0], [1], [0, 0, 1, 1], [], []>} : vector<24x8xf32>, vector<8x24xf32>, vector<24x24xf32> -> vector<24x24xf32>
    %cst_31 = arith.constant 0.353553385 : f32
    %83 = vector.broadcast %cst_31 : f32 to vector<24x24xf32>
    %84 = arith.mulf %82, %83 : vector<24x24xf32>
    %cst_32 = arith.constant dense<0xFF800000> : vector<24xf32>
    %85 = vector.multi_reduction <maximumf>, %84, %cst_32 [1] : vector<24x24xf32> to vector<24xf32>
    %86 = vector.shape_cast %85 : vector<24xf32> to vector<24x1xf32>
    %87 = vector.broadcast %86 : vector<24x1xf32> to vector<24x24xf32>
    %88 = arith.subf %84, %87 : vector<24x24xf32>
    %89 = math.exp %88 : vector<24x24xf32>
    %cst_33 = arith.constant dense<0.000000e+00> : vector<24xf32>
    %90 = vector.multi_reduction <add>, %89, %cst_33 [1] : vector<24x24xf32> to vector<24xf32>
    %91 = vector.shape_cast %90 : vector<24xf32> to vector<24x1xf32>
    %92 = tpu.reciprocal %91 {approx = true} : vector<24x1xf32> -> vector<24x1xf32>
    %93 = vector.broadcast %92 : vector<24x1xf32> to vector<24x24xf32>
    %94 = arith.mulf %89, %93 : vector<24x24xf32>
    %cst_34 = arith.constant dense<0.000000e+00> : vector<24x8xf32>
    %95 = tpu.matmul %94, %81, %cst_34 {dimension_numbers = #tpu.dot_dimension_numbers<[1], [0], [0], [1], [0, 0, 1, 1], [], []>} : vector<24x24xf32>, vector<24x8xf32>, vector<24x8xf32> -> vector<24x8xf32>
    %c16 = arith.constant 16 : index
    %c0_35 = arith.constant 0 : index
    %96 = vector.load %arg4[%c16, %c0_35] : memref<32x32xf32, #tpu.memory_space<vmem>>, vector<8x32xf32>
    %cst_36 = arith.constant dense<0.000000e+00> : vector<24x32xf32>
    %97 = tpu.matmul %95, %96, %cst_36 {dimension_numbers = #tpu.dot_dimension_numbers<[1], [0], [0], [1], [0, 0, 1, 1], [], []>} : vector<24x8xf32>, vector<8x32xf32>, vector<24x32xf32> -> vector<24x32xf32>
    %98 = arith.addf %78, %97 : vector<24x32xf32>
    %99 = vector.extract_strided_slice %35 {offsets = [0, 24], sizes = [24, 8], strides = [1, 1]} : vector<24x96xf32> to vector<24x8xf32>
    %100 = vector.extract_strided_slice %37 {offsets = [24, 0], sizes = [8, 24], strides = [1, 1]} : vector<32x24xf32> to vector<8x24xf32>
    %101 = vector.extract_strided_slice %35 {offsets = [0, 88], sizes = [24, 8], strides = [1, 1]} : vector<24x96xf32> to vector<24x8xf32>
    %cst_37 = arith.constant dense<0.000000e+00> : vector<24x24xf32>
    %102 = tpu.matmul %99, %100, %cst_37 {dimension_numbers = #tpu.dot_dimension_numbers<[1], [0], [0], [1], [0, 0, 1, 1], [], []>} : vector<24x8xf32>, vector<8x24xf32>, vector<24x24xf32> -> vector<24x24xf32>
    %cst_38 = arith.constant 0.353553385 : f32
    %103 = vector.broadcast %cst_38 : f32 to vector<24x24xf32>
    %104 = arith.mulf %102, %103 : vector<24x24xf32>
    %cst_39 = arith.constant dense<0xFF800000> : vector<24xf32>
    %105 = vector.multi_reduction <maximumf>, %104, %cst_39 [1] : vector<24x24xf32> to vector<24xf32>
    %106 = vector.shape_cast %105 : vector<24xf32> to vector<24x1xf32>
    %107 = vector.broadcast %106 : vector<24x1xf32> to vector<24x24xf32>
    %108 = arith.subf %104, %107 : vector<24x24xf32>
    %109 = math.exp %108 : vector<24x24xf32>
    %cst_40 = arith.constant dense<0.000000e+00> : vector<24xf32>
    %110 = vector.multi_reduction <add>, %109, %cst_40 [1] : vector<24x24xf32> to vector<24xf32>
    %111 = vector.shape_cast %110 : vector<24xf32> to vector<24x1xf32>
    %112 = tpu.reciprocal %111 {approx = true} : vector<24x1xf32> -> vector<24x1xf32>
    %113 = vector.broadcast %112 : vector<24x1xf32> to vector<24x24xf32>
    %114 = arith.mulf %109, %113 : vector<24x24xf32>
    %cst_41 = arith.constant dense<0.000000e+00> : vector<24x8xf32>
    %115 = tpu.matmul %114, %101, %cst_41 {dimension_numbers = #tpu.dot_dimension_numbers<[1], [0], [0], [1], [0, 0, 1, 1], [], []>} : vector<24x24xf32>, vector<24x8xf32>, vector<24x8xf32> -> vector<24x8xf32>
    %c24 = arith.constant 24 : index
    %c0_42 = arith.constant 0 : index
    %116 = vector.load %arg4[%c24, %c0_42] : memref<32x32xf32, #tpu.memory_space<vmem>>, vector<8x32xf32>
    %cst_43 = arith.constant dense<0.000000e+00> : vector<24x32xf32>
    %117 = tpu.matmul %115, %116, %cst_43 {dimension_numbers = #tpu.dot_dimension_numbers<[1], [0], [0], [1], [0, 0, 1, 1], [], []>} : vector<24x8xf32>, vector<8x32xf32>, vector<24x32xf32> -> vector<24x32xf32>
    %118 = arith.addf %98, %117 : vector<24x32xf32>
    %119 = arith.addf %4, %118 : vector<24x32xf32>
    %120 = vector.broadcast %25 : vector<1x32xf32> to vector<24x32xf32>
    %121 = arith.addf %119, %120 : vector<24x32xf32>
    %cst_44 = arith.constant dense<0.000000e+00> : vector<24xf32>
    %122 = vector.multi_reduction <add>, %121, %cst_44 [1] : vector<24x32xf32> to vector<24xf32>
    %123 = vector.shape_cast %122 : vector<24xf32> to vector<24x1xf32>
    %cst_45 = arith.constant 3.200000e+01 : f32
    %124 = vector.broadcast %cst_45 : f32 to vector<24x1xf32>
    %125 = arith.divf %123, %124 : vector<24x1xf32>
    %126 = vector.broadcast %125 : vector<24x1xf32> to vector<24x32xf32>
    %127 = arith.subf %121, %126 : vector<24x32xf32>
    %128 = arith.mulf %127, %127 : vector<24x32xf32>
    %cst_46 = arith.constant dense<0.000000e+00> : vector<24xf32>
    %129 = vector.multi_reduction <add>, %128, %cst_46 [1] : vector<24x32xf32> to vector<24xf32>
    %130 = vector.shape_cast %129 : vector<24xf32> to vector<24x1xf32>
    %cst_47 = arith.constant 3.200000e+01 : f32
    %131 = vector.broadcast %cst_47 : f32 to vector<24x1xf32>
    %132 = arith.divf %130, %131 : vector<24x1xf32>
    %133 = vector.broadcast %125 : vector<24x1xf32> to vector<24x32xf32>
    %134 = arith.subf %121, %133 : vector<24x32xf32>
    %cst_48 = arith.constant 9.99999974E-6 : f32
    %135 = vector.broadcast %cst_48 : f32 to vector<24x1xf32>
    %136 = arith.addf %132, %135 : vector<24x1xf32>
    %137 = math.rsqrt %136 : vector<24x1xf32>
    %138 = vector.broadcast %137 : vector<24x1xf32> to vector<24x32xf32>
    %139 = arith.mulf %134, %138 : vector<24x32xf32>
    %c0_49 = arith.constant 0 : index
    %c0_50 = arith.constant 0 : index
    %140 = vector.load %arg5[%c0_49, %c0_50] : memref<32x64xf32, #tpu.memory_space<vmem>>, vector<32x64xf32>
    %cst_51 = arith.constant dense<0.000000e+00> : vector<24x64xf32>
    %141 = tpu.matmul %139, %140, %cst_51 {dimension_numbers = #tpu.dot_dimension_numbers<[1], [0], [0], [1], [0, 0, 1, 1], [], []>} : vector<24x32xf32>, vector<32x64xf32>, vector<24x64xf32> -> vector<24x64xf32>
    %142 = vector.broadcast %26 : vector<1x64xf32> to vector<24x64xf32>
    %143 = arith.addf %141, %142 : vector<24x64xf32>
    %cst_52 = arith.constant 0.000000e+00 : f32
    %144 = vector.broadcast %cst_52 : f32 to vector<1x64xf32>
    %145 = vector.extract_strided_slice %143 {offsets = [0, 0], sizes = [23, 64], strides = [1, 1]} : vector<24x64xf32> to vector<23x64xf32>
    %146 = tpu.concatenate %144, %145 in 0 : vector<1x64xf32>, vector<23x64xf32> -> vector<24x64xf32>
    %147 = vector.extract_strided_slice %143 {offsets = [1, 0], sizes = [23, 64], strides = [1, 1]} : vector<24x64xf32> to vector<23x64xf32>
    %148 = tpu.concatenate %147, %144 in 0 : vector<23x64xf32>, vector<1x64xf32> -> vector<24x64xf32>
    %149 = tpu.iota {dimensions = array<i32: 0>} : vector<24x1xi32>
    %c0_i32 = arith.constant 0 : i32
    %150 = vector.broadcast %c0_i32 : i32 to vector<24x1xi32>
    %151 = arith.cmpi sge, %149, %150 : vector<24x1xi32>
    %c0_i32_53 = arith.constant 0 : i32
    %152 = vector.broadcast %c0_i32_53 : i32 to vector<24x1xi32>
    %153 = arith.cmpi sge, %149, %152 : vector<24x1xi32>
    %c0_i32_54 = arith.constant 0 : i32
    %154 = vector.broadcast %c0_i32_54 : i32 to vector<24x1xi32>
    %155 = arith.cmpi ne, %149, %154 : vector<24x1xi32>
    %156 = arith.andi %151, %155 : vector<24x1xi1>
    %c7_i32 = arith.constant 7 : i32
    %157 = vector.broadcast %c7_i32 : i32 to vector<24x1xi32>
    %158 = arith.cmpi ne, %149, %157 : vector<24x1xi32>
    %159 = arith.andi %153, %158 : vector<24x1xi1>
    %c8_i32 = arith.constant 8 : i32
    %160 = vector.broadcast %c8_i32 : i32 to vector<24x1xi32>
    %161 = arith.cmpi ne, %149, %160 : vector<24x1xi32>
    %162 = arith.andi %156, %161 : vector<24x1xi1>
    %c15_i32 = arith.constant 15 : i32
    %163 = vector.broadcast %c15_i32 : i32 to vector<24x1xi32>
    %164 = arith.cmpi ne, %149, %163 : vector<24x1xi32>
    %165 = arith.andi %159, %164 : vector<24x1xi1>
    %c16_i32 = arith.constant 16 : i32
    %166 = vector.broadcast %c16_i32 : i32 to vector<24x1xi32>
    %167 = arith.cmpi ne, %149, %166 : vector<24x1xi32>
    %168 = arith.andi %162, %167 : vector<24x1xi1>
    %c23_i32 = arith.constant 23 : i32
    %169 = vector.broadcast %c23_i32 : i32 to vector<24x1xi32>
    %170 = arith.cmpi ne, %149, %169 : vector<24x1xi32>
    %171 = arith.andi %165, %170 : vector<24x1xi1>
    %cst_55 = arith.constant 0.000000e+00 : f32
    %172 = vector.shape_cast %168 : vector<24x1xi1> to vector<24x1xi1>
    %173 = vector.broadcast %172 : vector<24x1xi1> to vector<24x64xi1>
    %174 = vector.broadcast %cst_55 : f32 to vector<24x64xf32>
    %175 = arith.select %173, %146, %174 : vector<24x64xi1>, vector<24x64xf32>
    %176 = vector.broadcast %27 : vector<1x64xf32> to vector<24x64xf32>
    %177 = arith.mulf %175, %176 : vector<24x64xf32>
    %178 = vector.broadcast %28 : vector<1x64xf32> to vector<24x64xf32>
    %179 = arith.mulf %143, %178 : vector<24x64xf32>
    %180 = arith.addf %177, %179 : vector<24x64xf32>
    %cst_56 = arith.constant 0.000000e+00 : f32
    %181 = vector.shape_cast %171 : vector<24x1xi1> to vector<24x1xi1>
    %182 = vector.broadcast %181 : vector<24x1xi1> to vector<24x64xi1>
    %183 = vector.broadcast %cst_56 : f32 to vector<24x64xf32>
    %184 = arith.select %182, %148, %183 : vector<24x64xi1>, vector<24x64xf32>
    %185 = vector.broadcast %29 : vector<1x64xf32> to vector<24x64xf32>
    %186 = arith.mulf %184, %185 : vector<24x64xf32>
    %187 = arith.addf %180, %186 : vector<24x64xf32>
    %188 = vector.broadcast %30 : vector<1x64xf32> to vector<24x64xf32>
    %189 = arith.addf %187, %188 : vector<24x64xf32>
    %cst_57 = arith.constant 5.000000e-01 : f32
    %190 = vector.broadcast %cst_57 : f32 to vector<24x64xf32>
    %191 = arith.mulf %190, %189 : vector<24x64xf32>
    %cst_58 = arith.constant 4.471500e-02 : f32
    %192 = vector.broadcast %cst_58 : f32 to vector<24x64xf32>
    %193 = arith.mulf %192, %189 : vector<24x64xf32>
    %194 = arith.mulf %193, %189 : vector<24x64xf32>
    %195 = arith.mulf %194, %189 : vector<24x64xf32>
    %196 = arith.addf %189, %195 : vector<24x64xf32>
    %cst_59 = arith.constant 0.797884583 : f32
    %197 = vector.broadcast %cst_59 : f32 to vector<24x64xf32>
    %198 = arith.mulf %197, %196 : vector<24x64xf32>
    %199 = math.tanh %198 : vector<24x64xf32>
    %cst_60 = arith.constant 1.000000e+00 : f32
    %200 = vector.broadcast %cst_60 : f32 to vector<24x64xf32>
    %201 = arith.addf %200, %199 : vector<24x64xf32>
    %202 = arith.mulf %191, %201 : vector<24x64xf32>
    %c0_61 = arith.constant 0 : index
    %c0_62 = arith.constant 0 : index
    %203 = vector.load %arg6[%c0_61, %c0_62] : memref<64x32xf32, #tpu.memory_space<vmem>>, vector<64x32xf32>
    %cst_63 = arith.constant dense<0.000000e+00> : vector<24x32xf32>
    %204 = tpu.matmul %202, %203, %cst_63 {dimension_numbers = #tpu.dot_dimension_numbers<[1], [0], [0], [1], [0, 0, 1, 1], [], []>} : vector<24x64xf32>, vector<64x32xf32>, vector<24x32xf32> -> vector<24x32xf32>
    %205 = vector.broadcast %31 : vector<1x32xf32> to vector<24x32xf32>
    %206 = arith.addf %204, %205 : vector<24x32xf32>
    %207 = arith.addf %121, %206 : vector<24x32xf32>
    %c0_64 = arith.constant 0 : index
    %c0_65 = arith.constant 0 : index
    %c0_66 = arith.constant 0 : index
    %208 = vector.load %arg8[%c0_64, %c0_65, %c0_66] : memref<1x24x32xf32, #tpu.memory_space<vmem>>, vector<1x24x32xf32>
    %209 = vector.shape_cast %208 : vector<1x24x32xf32> to vector<24x32xf32>
    %210 = vector.shape_cast %207 : vector<24x32xf32> to vector<1x24x32xf32>
    tpu.vector_store %arg8[%c0_64, %c0_65, %c0_66], %210 {strides = array<i32>} : memref<1x24x32xf32, #tpu.memory_space<vmem>>, vector<1x24x32xf32>,
    return
  }
  func.func @transform_0(%arg0: i32) -> (i32, i32, i32) {
    %c0_i32 = arith.constant 0 : i32
    %c0_i32_0 = arith.constant 0 : i32
    %c0_i32_1 = arith.constant 0 : i32
    return %arg0, %c0_i32, %c0_i32_0 : i32, i32, i32
  }
  func.func @transform_1(%arg0: i32) -> (i32, i32, i32) {
    %c0_i32 = arith.constant 0 : i32
    %c0_i32_0 = arith.constant 0 : i32
    %c0_i32_1 = arith.constant 0 : i32
    return %arg0, %c0_i32, %c0_i32_0 : i32, i32, i32
  }
  func.func @transform_2(%arg0: i32) -> (i32, i32) {
    %c0_i32 = arith.constant 0 : i32
    %c0_i32_0 = arith.constant 0 : i32
    %c0_i32_1 = arith.constant 0 : i32
    return %c0_i32, %c0_i32_0 : i32, i32
  }
  func.func @transform_3(%arg0: i32) -> (i32, i32) {
    %c0_i32 = arith.constant 0 : i32
    %c0_i32_0 = arith.constant 0 : i32
    %c0_i32_1 = arith.constant 0 : i32
    return %c0_i32, %c0_i32_0 : i32, i32
  }
  func.func @transform_4(%arg0: i32) -> (i32, i32) {
    %c0_i32 = arith.constant 0 : i32
    %c0_i32_0 = arith.constant 0 : i32
    %c0_i32_1 = arith.constant 0 : i32
    return %c0_i32, %c0_i32_0 : i32, i32
  }
  func.func @transform_5(%arg0: i32) -> (i32, i32) {
    %c0_i32 = arith.constant 0 : i32
    %c0_i32_0 = arith.constant 0 : i32
    %c0_i32_1 = arith.constant 0 : i32
    return %c0_i32, %c0_i32_0 : i32, i32
  }
  func.func @transform_6(%arg0: i32) -> (i32, i32) {
    %c0_i32 = arith.constant 0 : i32
    %c0_i32_0 = arith.constant 0 : i32
    %c0_i32_1 = arith.constant 0 : i32
    return %c0_i32, %c0_i32_0 : i32, i32
  }
  func.func @transform_7(%arg0: i32) -> (i32, i32, i32) {
    %c0_i32 = arith.constant 0 : i32
    %c0_i32_0 = arith.constant 0 : i32
    %c0_i32_1 = arith.constant 0 : i32
    return %arg0, %c0_i32, %c0_i32_0 : i32, i32, i32
  }
}

</mosaic_0001>

<bundles_post_ra>
// kernel: tpu_custom_call.1
= control target key start
LH: loop header
LB: loop body
LE: loop exit
PB: predicated region body
PF: predicated region fallthrough
CT: control target
= control target key end

     0   :  { %s2522_s0 = inlined_call_operand.vmem [shape: f32[2,24,32], index: 0, kind: input, shape index: {}]   ;;  %s2523_s1 = inlined_call_operand.vmem [shape: f32[2,24,32], index: 1, kind: input, shape index: {}]   ;;  %s2524_s2 = inlined_call_operand.hbm [shape: f32[32,96], index: 2, kind: input, shape index: {}]   ;;  %s2525_s3 = inlined_call_operand.hbm [shape: f32[32,32], index: 3, kind: input, shape index: {}]   ;;  %s2526_s4 = inlined_call_operand.hbm [shape: f32[32,64], index: 4, kind: input, shape index: {}]   ;;  %s2527_s5 = inlined_call_operand.vmem [shape: f32[64,32], index: 5, kind: input, shape index: {}]   ;;  %s2528_s6 = inlined_call_operand.hbm [shape: f32[8,128], index: 6, kind: input, shape index: {}]   ;;  %s2529_s7 = inlined_call_operand.hbm [shape: f32[2,24,32], index: 7, kind: output, shape index: {}]  }
   0x1   :  { %2530 = sst [smem:[#allocation16_spill]] %s2524_s2 }
   0x2   :  { %2531 = sst [smem:[#allocation17_spill]] %s2525_s3 }
   0x3   :  { %12 = vsyncpa [#allocation3], 0 }
   0x4   :  { %13 = vsyncpa [#allocation6], 0 }
   0x5   :  { %14 = vsyncpa [#allocation9], 0 }
   0x6   :  { %15 = vsyncpa [#allocation4], 0 }
   0x7   :  { %17 = vsyncpa [#allocation4 + $0x1], 0  ;;  %s2104_s24 = smov 0   ;;  %s2106_s25 = smov 0  }
   0x8   :  { %s2108_s26 = smov 0   ;;  %s2110_s27 = smov 0  }
   0x9 LB: > { %s2125_s28 = sadd.s32 4294967295, %s2042_s27   ;;  %s1583_s29 = sadd.s32 4294967294, %s2042_s27   ;;  %s2042_s27 = sphi %s2110_s27, %s2543_s27   ;;  %s2038_s26 = sphi %s2108_s26, %s2542_s26   ;;  %s2034_s25 = sphi %s2106_s25, %s2541_s25   ;;  %s2030_s24 = sphi %s2104_s24, %s2540_s24  }
   0xa   : > { %s2129_s30 = sadd.s32 1, %s2042_s27   ;;  %s187_s8 = sadd.s32 1, %s2038_s26 }
   0xb   : > { %s184_s9 = ssub.s32 %s2042_s27, %s2129_s30  ;;  %p197_p0 = scmp.ne.s32.totalorder %s2038_s26, %s2034_s25 }
   0xc   : > { %p185_p1 = scmp.eq.s32.totalorder %s184_s9, 0  ;;  %p198_p2 = scmp.eq.s32.totalorder %s2125_s28, 1 }
   0xd   : > { %p203_p3 = scmp.ne.s32.totalorder %s2034_s25, %s2030_s24  ;;  %p204_p4 = scmp.eq.s32.totalorder %s1583_s29, 1 }
   0xe   : > { %s2140_s10 = scalar_select %p185_p1, %s2038_s26, %s187_s8  }
   0xf   : > { %p2142_p5 = por %p198_p2, %p197_p0  ;;  %p2146_p6 = por %p204_p4, %p203_p3 }
  0x10   : > { %2532 = sst [smem:[#allocation15_spill]] %s2140_s10  ;;  %p1584_p7 = scmp.ge.s32.totalorder %s2042_s27, 1 }
  0x11   : > { %p211_p8 = scmp.lt.s32.totalorder %s2042_s27, 3  ;;  %p1698_p9 = scmp.eq.s32.totalorder %s2125_s28, 0 }
  0x12   : > { %s2536_s3 = sld [smem:[#allocation17_spill]]  ;;  %s2044_s21 = smov [#allocation5]  }
  0x13   : > { %p2153_p10 = pnand %p1584_p7, %p211_p8  ;;  %s2537_s2 = sld [smem:[#allocation16_spill]] }
  0x14   : > { %s238_s22 = sshll.u32 %s2044_s21, 4  ;;  %s2045_s23 = smov 128   ;;  %s239_s22 = int_to_ptr.vmem [resolvable:$true] %s238_s22 }
  0x15   : > { %p1681_p11 = pneg %p2153_p10  ;;  %s2046_s29 = smov 8  }
  0x16   : > { %s2047_s8 = smov [#allocation2]   ;;  %s250_s17 = sshll.u32 %s2526_s4, 4  ;;  %s251_s17 = int_to_ptr.hbm [resolvable:$true] %s250_s17 }
  0x17   : > { %p2167_p12 = pnand %p1698_p9, %p1681_p11  ;;  %s224_s9 = sshll.u32 %s2047_s8, 4  ;;  %s225_s9 = int_to_ptr.vmem [resolvable:$true] %s224_s9 }
  0x18   : > { %s236_s16 = sshll.u32 %s2536_s3, 4  ;;  %s2048_s3 = smov [#allocation7]   ;;  %s237_s16 = int_to_ptr.hbm [resolvable:$true] %s236_s16 }
  0x19   : > { %s222_s19 = sshll.u32 %s2537_s2, 4  ;;  %s268_s2 = sshll.u32 %s2528_s6, 4  ;;  %s223_s19 = int_to_ptr.hbm [resolvable:$true] %s222_s19  ;;  %s269_s2 = int_to_ptr.hbm [resolvable:$true] %s268_s2 }
  0x1a   : > { %1687 = dma.hbm_to_vmem [thread:$0]  (!%p2167_p12), %s237_s16, 512, %s239_s22, [#allocation6], %s2045_s23, %s2045_s23, %s2046_s29  }
  0x1b   : > { %1684 = dma.hbm_to_vmem [thread:$0]  (!%p2167_p12), %s223_s19, 512, %s225_s9, [#allocation3], %s2045_s23, %s2045_s23, %s2046_s29  }
  0x1c   : > { %s252_s10 = sshll.u32 %s2048_s3, 4  ;;  %s2049_s16 = smov [#allocation8]   ;;  %s253_s10 = int_to_ptr.vmem [resolvable:$true] %s252_s10 }
  0x1d   : > { %1690 = dma.hbm_to_vmem [thread:$0]  (!%p2167_p12), %s251_s17, 512, %s253_s10, [#allocation6], %s2045_s23, %s2045_s23, %s2046_s29  }
  0x1e   : > { %s270_s22 = sshll.u32 %s2049_s16, 4  ;;  %299 = sbr.rel (%p2153_p10) target bundleno = 2435 (0x983), region = 48  ;;  %s271_s22 = int_to_ptr.vmem [resolvable:$true] %s270_s22 }
  0x1f   : > { %1693 = dma.hbm_to_vmem [thread:$0]  (!%p2167_p12), %s269_s2, 128, %s271_s22, [#allocation9]  }
  0x23   : > { %2013 = dma.done.wait (%p1698_p9), [#allocation3], 512  }
  0x24   : > { %2015 = vsyncadd (%p1698_p9), [#allocation3], 4294966784 }
  0x25   : > { %2017 = dma.done.wait (%p1698_p9), [#allocation6], 1024  }
  0x26   : > { %2019 = vsyncadd (%p1698_p9), [#allocation6], 4294966272 }
  0x27   : > { %2021 = dma.done.wait (%p1698_p9), [#allocation9], 128  }
  0x28   : > { %2023 = vsyncadd (%p1698_p9), [#allocation9], 4294967168  ;;  %p352_p13 = scmp.lt.s32.totalorder %s2125_s28, 1  ;;  %vm371_vm0 = vcmask 261120   ;;  %v2050_v12 = vmov 32.0   ;;  %v449_v34 = vld [vmem:[#allocation2 + $0x18] sm:$0xff] }
  0x29   : > { %1779 = vrcp.f32 %v2050_v12  ;;  %472 = vmatpush.msra.mxu0 %v449_v34  ;;  %v448_v35 = vld [vmem:[#allocation2 + $0x10] sm:$0xff]  ;;  %v447_v36 = vld [vmem:[#allocation2 + $0x8] sm:$0xff]  ;;  %v446_v37 = vld [vmem:[#allocation2] sm:$0xff]  ;;  %s2051_s8 = smov 96   ;;  %vm495_vm11 = vcmask 64512   ;;  %vm537_vm12 = vcmask 195584  }
  0x2a   : > { %s353_s2 = scalar_select %p352_p13, %s2125_s28, 1 }
  0x2b   : > { %473 = vmatpush.msra.mxu0 %v448_v35  ;;  %s2052_s9 = smov 64   ;;  %s2053_s14 = smov 88  }
  0x2c   : > { %s1661_s3 = smul.u32 24, %s353_s2  ;;  %s2054_s15 = smov 120  }
  0x2d   : > { %474 = vmatpush.msra.mxu0 %v447_v36  ;;  %s2055_s17 = smov 80   ;;  %s2056_s18 = smov 72  }
  0x2e   : > { %s356_s19 = scalar_lea.vmem %s2522_s0, %s1661_s3  ;;  %s361_s29 = scalar_lea.vmem %s2523_s1, %s1661_s3 }
  0x2f   : > { %v362_v0 = vld [vmem:[%s356_s19] sm:$0xff]  ;;  %v364_v3 = vld [vmem:[%s356_s19 + $0x10] sm:$0xff]  ;;  %v363_v5 = vld [vmem:[%s356_s19 + $0x8] sm:$0xff]  ;;  %v1780_v13 = vpop.eup %1779  ;;  %475 = vmatpush.msra.mxu0 %v446_v37  ;;  %s2057_s21 = smov 112   ;;  %s2058_s16 = smov 104  }
  0x30   : > { %v365_v1 = vld [vmem:[%s361_s29] sm:$0xff]  ;;  %v367_v4 = vld [vmem:[%s361_s29 + $0x10] sm:$0xff]  ;;  %v366_v6 = vld [vmem:[%s361_s29 + $0x8] sm:$0xff]  ;;  %v382_v14 = vmul.f32 32.0, %v1780_v13  ;;  %vm386_vm1 = vweird.f32 %v1780_v13  ;;  %s2059_s22 = smov 56   ;;  %s2060_s2 = smov 40  }
  0x31   : > { %v2207_v2 = vadd.f32 %v365_v1, %v362_v0  ;;  %v2209_v7 = vadd.f32 %v367_v4, %v364_v3  ;;  %v2215_v10 = vadd.f32 %v366_v6, %v363_v5  ;;  %s2061_s3 = smov 48   ;;  %s1662_s19 = smul.u32 24, %s2125_s28 }
  0x32   : > { %v383_v15 = vsub.f32 1.0, %v382_v14 }
  0x33   : > { %v372_v8 = vsel %vm371_vm0, %v2207_v2, 0.0  ;;  %v378_v9 = vsel %vm371_vm0, %v2209_v7, 0.0  ;;  %v375_v11 = vsel %vm371_vm0, %v2215_v10, 0.0  ;;  %s1464_s29 = scalar_lea.hbm %s2529_s7, %s1662_s19 }
  0x34   : > { %373 = vadd.xlane.f32.xlu0 %v372_v8  ;;  %379 = vadd.xlane.f32.xlu1 %v378_v9  ;;  %v384_v16 = vmul.f32 %v1780_v13, %v383_v15  ;;  %v2236_v9 = vld [vmem:[#allocation8] sm:$0xff] }
  0x36   : > { %v385_v17 = vadd.f32 %v1780_v13, %v384_v16 }
  0x38   : > { %v2219_v18 = vsel %vm386_vm1, %v1780_v13, %v385_v17 }
  0x3c   : > { %376 = vadd.xlane.f32.xlu0 %v375_v11  ;;  %v450_v11 = vperm.slane %v2236_v9, 0 }
  0xa7   : > { %v374_v19 = vpop.xlane.xlu0 %373  ;;  %v380_v23 = vpop.xlane.xlu1 %379 }
  0xa8   : > { %v388_v20 = vmul.f32 %v2219_v18, %v374_v19  ;;  %v390_v27 = vmul.f32 %v2219_v18, %v380_v23 }
  0xaa   : > { %v391_v21 = vsub.f32 %v2207_v2, %v388_v20  ;;  %v393_v29 = vsub.f32 %v2209_v7, %v390_v27 }
  0xac   : > { %v394_v22 = vmul.f32 %v391_v21, %v391_v21  ;;  %v396_v32 = vmul.f32 %v393_v29, %v393_v29 }
  0xae   : > { %v397_v24 = vsel %vm371_vm0, %v394_v22, 0.0  ;;  %v403_v33 = vsel %vm371_vm0, %v396_v32, 0.0 }
  0xaf   : > { %398 = vadd.xlane.f32.xlu1 %v397_v24  ;;  %v377_v25 = vpop.xlane.xlu0 %376 }
  0xb0   : > { %v389_v26 = vmul.f32 %v2219_v18, %v377_v25 }
  0xb2   : > { %v392_v28 = vsub.f32 %v2215_v10, %v389_v26 }
  0xb4   : > { %v395_v30 = vmul.f32 %v392_v28, %v392_v28 }
  0xb6   : > { %v400_v31 = vsel %vm371_vm0, %v395_v30, 0.0 }
  0xb7   : > { %401 = vadd.xlane.f32.xlu2 %v400_v31 }
  0xbf   : > { %404 = vadd.xlane.f32.xlu2 %v403_v33 }
 0x122   : > { %v399_v38 = vpop.xlane.xlu1 %398 }
 0x123   : > { %v406_v39 = vmul.f32 %v399_v38, %v2219_v18 }
 0x125   : > { %v409_v40 = vadd.f32 1e-05, %v406_v39 }
 0x127   : > { %1781 = vrsqrt.f32 %v409_v40  ;;  %vm418_vm3 = vweird.f32 %v409_v40 }
 0x12a   : > { %v402_v41 = vpop.xlane.xlu2 %401 }
 0x12b   : > { %v407_v42 = vmul.f32 %v402_v41, %v2219_v18 }
 0x12d   : > { %v1782_v43 = vpop.eup %1781  ;;  %v410_v44 = vadd.f32 1e-05, %v407_v42 }
 0x12e   : > { %v413_v45 = vmul.f32 %v1782_v43, %v409_v40  ;;  %vm419_vm2 = vweird.f32 %v1782_v43 }
 0x12f   : > { %1783 = vrsqrt.f32 %v410_v44  ;;  %vm420_vm4 = vmor %vm418_vm3, %vm419_vm2  ;;  %vm428_vm6 = vweird.f32 %v410_v44 }
 0x130   : > { %v414_v46 = vmul.f32 %v1782_v43, %v413_v45 }
 0x132   : > { %v415_v47 = vmul.f32 0.5, %v414_v46  ;;  %v405_v48 = vpop.xlane.xlu2 %404 }
 0x133   : > { %v408_v49 = vmul.f32 %v405_v48, %v2219_v18 }
 0x134   : > { %v416_v50 = vsub.f32 1.5, %v415_v47 }
 0x135   : > { %v1784_v51 = vpop.eup %1783  ;;  %v411_v52 = vadd.f32 1e-05, %v408_v49 }
 0x136   : > { %v423_v53 = vmul.f32 %v1784_v51, %v410_v44  ;;  %v417_v54 = vmul.f32 %v1782_v43, %v416_v50  ;;  %vm429_vm5 = vweird.f32 %v1784_v51 }
 0x137   : > { %1785 = vrsqrt.f32 %v411_v52  ;;  %vm430_vm7 = vmor %vm428_vm6, %vm429_vm5  ;;  %vm438_vm9 = vweird.f32 %v411_v52 }
 0x138   : > { %v424_v55 = vmul.f32 %v1784_v51, %v423_v53  ;;  %v421_v56 = vsel %vm420_vm4, %v1782_v43, %v417_v54 }
 0x139   : > { %v442_v57 = vmul.f32 %v421_v56, %v391_v21 }
 0x13a   : > { %v425_v58 = vmul.f32 0.5, %v424_v55 }
 0x13b   : > { %1597 = vmatmul.msk.f32.vlgmr.msra.gmra.mxu0 %vm371_vm0, %v442_v57 }
 0x13c   : > { %v426_v59 = vsub.f32 1.5, %v425_v58 }
 0x13d   : > { %v1786_v60 = vpop.eup %1785 }
 0x13e   : > { %v433_v61 = vmul.f32 %v1786_v60, %v411_v52  ;;  %v427_v62 = vmul.f32 %v1784_v51, %v426_v59  ;;  %vm439_vm8 = vweird.f32 %v1786_v60 }
 0x13f   : > { %vm440_vm10 = vmor %vm438_vm9, %vm439_vm8  ;;  %vm1281_vm9 = vcmask 1046528  }
 0x140   : > { %v434_v63 = vmul.f32 %v1786_v60, %v433_v61  ;;  %v431_v0 = vsel %vm430_vm7, %v1784_v51, %v427_v62  ;;  %v615_v51 = vld [vmem:[#allocation5] sm:$0xff]  ;;  %vm1271_vm7 = vcmask 1040384  }
 0x141   : > { %v443_v1 = vmul.f32 %v431_v0, %v392_v28 }
 0x142   : > { %v435_v3 = vmul.f32 0.5, %v434_v63 }
 0x143   : > { %1598 = vmatmul.msk.f32.gmra.mxu0 %vm371_vm0, %v443_v1 }
 0x144   : > { %v436_v4 = vsub.f32 1.5, %v435_v3 }
 0x146   : > { %v437_v5 = vmul.f32 %v1786_v60, %v436_v4 }
 0x148   : > { %v441_v6 = vsel %vm440_vm10, %v1786_v60, %v437_v5 }
 0x149   : > { %v444_v8 = vmul.f32 %v441_v6, %v393_v29 }
 0x14b   : > { %1599 = vmatmul.msk.f32.gmra.mxu0 %vm371_vm0, %v444_v8 }
 0x1b8   : > { %v477_v12 = vpop.f32.mrf.mxu0 }
 0x1b9   : > { %v2239_v13 = vadd.f32 %v477_v12, %v450_v11 }
 0x1bb   : > { %489 = vrot.lane.b32.xlu2 %v2239_v13, %s2051_s8 }
 0x1c0   : > { %v480_v14 = vpop.f32.mrf.mxu0 }
 0x1c1   : > { %v2242_v15 = vadd.f32 %v480_v14, %v450_v11 }
 0x1c3   : > { %491 = vrot.lane.b32.xlu1 %v2242_v15, %s2051_s8 }
 0x1c8   : > { %v483_v16 = vpop.f32.mrf.mxu0 }
 0x1c9   : > { %v2245_v17 = vadd.f32 %v483_v16, %v450_v11 }
 0x1cb   : > { %493 = vrot.lane.b32.xlu0 %v2245_v17, %s2051_s8  ;;  %v2265_v31 = vpack.i.bf16 %v2242_v15, %v2245_v17 }
 0x215   : > { %v490_v21 = vpop.permute.xlu2 %489 }
 0x235   : > { %v492_v20 = vpop.permute.xlu1 %491 }
 0x23d   : > { %v494_v19 = vpop.permute.xlu0 %493 }
 0x23e   : > { %1600 = vmatpush.xpose.msk.msra.mxu1 %vm495_vm11, %v494_v19  ;;  %1657 = vmatpush.xpose.msk.msra.mxu3 %vm495_vm11, %v494_v19 }
 0x242   : > { %1601 = vmatpush.xpose.msk.msra.mxu1 %vm495_vm11, %v492_v20  ;;  %1658 = vmatpush.xpose.msk.msra.mxu3 %vm495_vm11, %v492_v20 }
 0x246   : > { %1602 = vmatpush.xpose.msk.msra.mxu1 %vm495_vm11, %v490_v21  ;;  %1659 = vmatpush.xpose.msk.msra.mxu3 %vm495_vm11, %v490_v21 }
 0x249   : > { %1603 = vmatmul.msk.f32.vlgmr.msra.gmra.mxu1 %vm495_vm11, %v2239_v13  ;;  %1604 = vmatmul.msk.f32.vlgmr.msra.gmra.mxu3 %vm495_vm11, %v2242_v15 }
 0x24a   : > { %806 = vmatpush.msrb.mxu1 %v615_v51 }
 0x251   : > { %1605 = vmatmul.msk.f32.gmra.mxu3 %vm495_vm11, %v2245_v17 }
 0x2c6   : > { %v525_v22 = vpop.f32.mrf.mxu1 }
 0x2c7   : > { %v534_v23 = vmul.f32 0.35355338, %v525_v22 }
 0x2c9   : > { %v538_v24 = vsel %vm537_vm12, %v534_v23, -inf }
 0x2ca   : > { %539 = vmax.xlane.f32.xlu0 %v538_v24 }
 0x2cc   : > { %v528_v25 = vpop.f32.mrf.mxu3 }
 0x2cd   : > { %v535_v26 = vmul.f32 0.35355338, %v528_v25 }
 0x2cf   : > { %v541_v27 = vsel %vm537_vm12, %v535_v26, -inf }
 0x2d0   : > { %542 = vmax.xlane.f32.xlu2 %v541_v27 }
 0x2d4   : > { %v531_v28 = vpop.f32.mrf.mxu3 }
 0x2d5   : > { %v536_v29 = vmul.f32 0.35355338, %v531_v28 }
 0x2d7   : > { %v544_v30 = vsel %vm537_vm12, %v536_v29, -inf }
 0x2d8   : > { %545 = vmax.xlane.f32.xlu1 %v544_v30 }
 0x2e8   : > { %1760 = vrot.lane.b32.xlu2 %v2265_v31, %s2052_s9 }
 0x2f0   : > { %624 = vrot.lane.b32.xlu2 %v2242_v15, %s2053_s14 }
 0x2f8   : > { %616 = vrot.lane.b32.xlu2 %v2239_v13, %s2054_s15 }
 0x300   : > { %827 = vrot.lane.b32.xlu2 %v2245_v17, %s2055_s17 }
 0x308   : > { %825 = vrot.lane.b32.xlu2 %v2242_v15, %s2055_s17 }
 0x310   : > { %992 = vrot.lane.b32.xlu2 %v2239_v13, %s2056_s18 }
 0x318   : > { %819 = vrot.lane.b32.xlu2 %v2242_v15, %s2057_s21 }
 0x320   : > { %990 = vrot.lane.b32.xlu2 %v2245_v17, %s2058_s16 }
 0x33d   : > { %v540_v32 = vpop.xlane.xlu0 %539 }
 0x33e   : > { %v547_v33 = vsub.f32 %v534_v23, %v540_v32 }
 0x340   : > { %v550_v34 = vmul.f32 1.442695, %v547_v33 }
 0x342   : > { %1787 = vpow2.f32 %v550_v34 }
 0x343   : > { %v543_v35 = vpop.xlane.xlu2 %542 }
 0x344   : > { %v548_v36 = vsub.f32 %v535_v26, %v543_v35 }
 0x346   : > { %v552_v37 = vmul.f32 1.442695, %v548_v36 }
 0x348   : > { %v1788_v38 = vpop.eup %1787  ;;  %1789 = vpow2.f32 %v552_v37 }
 0x349   : > { %v556_v39 = vsel %vm537_vm12, %v1788_v38, 0.0 }
 0x34a   : > { %557 = vadd.xlane.f32.xlu0 %v556_v39 }
 0x34b   : > { %v1761_v40 = vpop.permute.xlu2 %1760  ;;  %v546_v41 = vpop.xlane.xlu1 %545 }
 0x34c   : > { %v549_v42 = vsub.f32 %v536_v29, %v546_v41  ;;  %v1762_v43 = vunpack.i.l.bf16 %v1761_v40  ;;  %v1763_v46 = vunpack.i.h.bf16 %v1761_v40 }
 0x34e   : > { %v1790_v44 = vpop.eup %1789  ;;  %v554_v45 = vmul.f32 1.442695, %v549_v42  ;;  %602 = vmatpush.msra.mxu2 %v1762_v43 }
 0x34f   : > { %v559_v47 = vsel %vm537_vm12, %v1790_v44, 0.0 }
 0x350   : > { %1791 = vpow2.f32 %v554_v45  ;;  %603 = vmatpush.msra.mxu2 %v1763_v46  ;;  %560 = vadd.xlane.f32.xlu1 %v559_v47 }
 0x353   : > { %v625_v53 = vpop.permute.xlu2 %624 }
 0x356   : > { %v1792_v48 = vpop.eup %1791 }
 0x357   : > { %v562_v49 = vsel %vm537_vm12, %v1792_v48, 0.0 }
 0x358   : > { %563 = vadd.xlane.f32.xlu1 %v562_v49 }
 0x35b   : > { %v617_v59 = vpop.permute.xlu2 %616 }
 0x35e   : > { %571 = vrot.lane.b32.xlu0 %v2239_v13, %s2052_s9  ;;  %s1467_s9 = sshll.u32 %s1464_s29, 4  ;;  %s1468_s9 = int_to_ptr.hbm [resolvable:$true] %s1467_s9 }
 0x363   : > { %v828_v63 = vpop.permute.xlu2 %827 }
 0x366   : > { %622 = vrot.lane.b32.xlu0 %v2239_v13, %s2053_s14 }
 0x36b   : > { %v826_v5 = vpop.permute.xlu2 %825 }
 0x36e   : > { %618 = vrot.lane.b32.xlu0 %v2242_v15, %s2054_s15 }
 0x371   : > { %626 = vrot.lane.b32.xlu1 %v2245_v17, %s2053_s14  ;;  %s1982_s14 = sshra.s32 %s1468_s9, 4  ;;  %s1983_s14 = int_to_ptr.hbm [resolvable:$true] %s1982_s14 }
 0x372   : > { %p1989_p3 = scmp.lt.s32.totalorder %s1983_s14, %s2529_s7 }
 0x373   : > { %v993_v12 = vpop.permute.xlu2 %992 }
 0x376   : > { %996 = vrot.lane.b32.xlu0 %v2245_v17, %s2056_s18 }
 0x379   : > { %620 = vrot.lane.b32.xlu1 %v2245_v17, %s2054_s15  ;;  %s1984_s15 = scalar_lea.hbm %s1983_s14, 24 }
 0x37a   : > { %p1985_p0 = scmp.ne.s32.totalorder %s1983_s14, %s1984_s15 }
 0x37b   : > { %v820_v16 = vpop.permute.xlu2 %819 }
 0x37c   : > { %p1986_p1 = pnand %p1985_p0, %p2142_p5 }
 0x37e   : > { %994 = vrot.lane.b32.xlu0 %v2242_v15, %s2056_s18  ;;  %p1987_p2 = pneg %p1986_p1 }
 0x381   : > { %823 = vrot.lane.b32.xlu1 %v2239_v13, %s2055_s17 }
 0x383   : > { %v991_v28 = vpop.permute.xlu2 %990 }
 0x386   : > { %817 = vrot.lane.b32.xlu0 %v2239_v13, %s2057_s21 }
 0x389   : > { %986 = vrot.lane.b32.xlu1 %v2239_v13, %s2058_s16 }
 0x38e   : > { %988 = vrot.lane.b32.xlu0 %v2242_v15, %s2058_s16 }
 0x391   : > { %821 = vrot.lane.b32.xlu1 %v2245_v17, %s2057_s21  ;;  %s1988_s21 = scalar_lea.hbm %s2529_s7, 48 }
 0x392   : > { %p1990_p4 = scmp.lt.s32.totalorder %s1988_s21, %s1984_s15 }
 0x394   : > { %p1991_p7 = por %p1990_p4, %p1989_p3 }
 0x396   : > { %p1992_p8 = pnand %p1991_p7, %p1987_p2 }
 0x3bd   : > { %v558_v50 = vpop.xlane.xlu0 %557 }
 0x3be   : > { %1793 = vrcp.f32 %v558_v50 }
 0x3c3   : > { %v561_v52 = vpop.xlane.xlu1 %560 }
 0x3c4   : > { %v1794_v54 = vpop.eup %1793  ;;  %1795 = vrcp.f32 %v561_v52 }
 0x3c5   : > { %v568_v56 = vmul.f32 %v1794_v54, %v1788_v38 }
 0x3ca   : > { %v1796_v58 = vpop.eup %1795 }
 0x3cb   : > { %v564_v57 = vpop.xlane.xlu1 %563  ;;  %v569_v61 = vmul.f32 %v1796_v58, %v1790_v44 }
 0x3cc   : > { %1797 = vrcp.f32 %v564_v57 }
 0x3d0   : > { %v572_v55 = vpop.permute.xlu0 %571 }
 0x3d1   : > { %604 = vmatpush.msra.mxu2 %v572_v55 }
 0x3d2   : > { %1606 = vmatmul.msk.f32.vlgmr.msra.gmra.mxu2 %vm537_vm12, %v568_v56  ;;  %v1798_v62 = vpop.eup %1797 }
 0x3d3   : > { %v570_v1 = vmul.f32 %v1798_v62, %v1792_v48 }
 0x3d8   : > { %v623_v60 = vpop.permute.xlu0 %622 }
 0x3da   : > { %1607 = vmatmul.msk.f32.gmra.mxu2 %vm537_vm12, %v569_v61 }
 0x3e0   : > { %v619_v0 = vpop.permute.xlu0 %618 }
 0x3e2   : > { %1608 = vmatmul.msk.f32.gmra.mxu2 %vm537_vm12, %v570_v1 }
 0x3e3   : > { %v627_v3 = vpop.permute.xlu1 %626 }
 0x3e4   : > { %1609 = vmatpush.xpose.msk.msrb.mxu3 %vm495_vm11, %v627_v3 }
 0x3e8   : > { %1610 = vmatpush.xpose.msk.msrb.mxu3 %vm495_vm11, %v625_v53  ;;  %v997_v4 = vpop.permute.xlu0 %996 }
 0x3e9   : > { %1636 = vmatpush.xpose.msk.msra.mxu1 %vm495_vm11, %v997_v4 }
 0x3eb   : > { %v621_v6 = vpop.permute.xlu1 %620 }
 0x3ec   : > { %1611 = vmatpush.xpose.msk.msrb.mxu3 %vm495_vm11, %v623_v60 }
 0x3ef   : > { %1612 = vmatmul.msk.f32.vlgmr.msrb.gmra.mxu3 %vm495_vm11, %v617_v59 }
 0x3f0   : > { %1624 = vmatpush.xpose.msk.msra.mxu3 %vm495_vm11, %v828_v63  ;;  %v995_v8 = vpop.permute.xlu0 %994 }
 0x3f1   : > { %1637 = vmatpush.xpose.msk.msra.mxu1 %vm495_vm11, %v995_v8 }
 0x3f3   : > { %v824_v11 = vpop.permute.xlu1 %823 }
 0x3f4   : > { %1625 = vmatpush.xpose.msk.msra.mxu3 %vm495_vm11, %v826_v5 }
 0x3f5   : > { %1638 = vmatpush.xpose.msk.msra.mxu1 %vm495_vm11, %v993_v12 }
 0x3f7   : > { %1613 = vmatmul.msk.f32.gmra.mxu3 %vm495_vm11, %v619_v0 }
 0x3f8   : > { %1626 = vmatpush.xpose.msk.msra.mxu3 %vm495_vm11, %v824_v11  ;;  %v818_v14 = vpop.permute.xlu0 %817 }
 0x3fb   : > { %v987_v15 = vpop.permute.xlu1 %986 }
 0x3ff   : > { %1614 = vmatmul.msk.f32.gmra.mxu3 %vm495_vm11, %v621_v6 }
 0x400   : > { %v989_v24 = vpop.permute.xlu0 %988 }
 0x403   : > { %v822_v17 = vpop.permute.xlu1 %821 }
 0x407   : > { %1627 = vmatmul.msk.f32.vlgmr.msra.gmra.mxu3 %vm495_vm11, %v818_v14 }
 0x40f   : > { %1628 = vmatmul.msk.f32.gmra.mxu3 %vm495_vm11, %v820_v16 }
 0x417   : > { %1629 = vmatmul.msk.f32.gmra.mxu3 %vm495_vm11, %v822_v17 }
 0x455   : > { %v606_v19 = vpop.f32.mrf.mxu2 }
 0x456   : > { %1621 = vmatmul.msk.f32.vlgmr.msrb.gmra.mxu1 %vm495_vm11, %v606_v19 }
 0x45d   : > { %v609_v20 = vpop.f32.mrf.mxu2 }
 0x45e   : > { %1622 = vmatmul.msk.f32.gmra.mxu1 %vm495_vm11, %v609_v20 }
 0x465   : > { %v612_v21 = vpop.f32.mrf.mxu2 }
 0x466   : > { %1623 = vmatmul.msk.f32.gmra.mxu1 %vm495_vm11, %v612_v21 }
 0x46e   : > { %1639 = vmatmul.msk.f32.vlgmr.msra.gmra.mxu1 %vm495_vm11, %v987_v15 }
 0x472   : > { %v657_v22 = vpop.f32.mrf.mxu3 }
 0x473   : > { %v666_v23 = vmul.f32 0.35355338, %v657_v22 }
 0x475   : > { %v669_v25 = vsel %vm537_vm12, %v666_v23, -inf }
 0x476   : > { %670 = vmax.xlane.f32.xlu0 %v669_v25  ;;  %1640 = vmatmul.msk.f32.gmra.mxu1 %vm495_vm11, %v989_v24 }
 0x47a   : > { %v660_v26 = vpop.f32.mrf.mxu3 }
 0x47b   : > { %v667_v27 = vmul.f32 0.35355338, %v660_v26 }
 0x47d   : > { %v672_v29 = vsel %vm537_vm12, %v667_v27, -inf }
 0x47e   : > { %673 = vmax.xlane.f32.xlu1 %v672_v29  ;;  %1641 = vmatmul.msk.f32.gmra.mxu1 %vm495_vm11, %v991_v28 }
 0x482   : > { %v663_v30 = vpop.f32.mrf.mxu3 }
 0x483   : > { %v668_v32 = vmul.f32 0.35355338, %v663_v30 }
 0x485   : > { %v675_v33 = vsel %vm537_vm12, %v668_v32, -inf }
 0x486   : > { %676 = vmax.xlane.f32.xlu2 %v675_v33 }
 0x48a   : > { %v858_v34 = vpop.f32.mrf.mxu3 }
 0x48b   : > { %v867_v35 = vmul.f32 0.35355338, %v858_v34 }
 0x48d   : > { %v870_v36 = vsel %vm537_vm12, %v867_v35, -inf }
 0x48e   : > { %871 = vmax.xlane.f32.xlu1 %v870_v36 }
 0x492   : > { %v861_v37 = vpop.f32.mrf.mxu3 }
 0x493   : > { %v868_v38 = vmul.f32 0.35355338, %v861_v37 }
 0x495   : > { %v873_v39 = vsel %vm537_vm12, %v868_v38, -inf }
 0x496   : > { %874 = vmax.xlane.f32.xlu0 %v873_v39 }
 0x49a   : > { %v864_v40 = vpop.f32.mrf.mxu3 }
 0x49b   : > { %v2339_v41 = vmul.f32 0.35355338, %v864_v40 }
 0x49d   : > { %v876_v42 = vsel %vm537_vm12, %v2339_v41, -inf }
 0x49e   : > { %877 = vmax.xlane.f32.xlu2 %v876_v42 }
 0x4d3   : > { %v2343_v43 = vpop.f32.mrf.mxu1 }
 0x4db   : > { %v2345_v44 = vpop.f32.mrf.mxu1 }
 0x4e3   : > { %v2347_v45 = vpop.f32.mrf.mxu1 }
 0x4e9   : > { %v671_v46 = vpop.xlane.xlu0 %670 }
 0x4ea   : > { %v678_v47 = vsub.f32 %v666_v23, %v671_v46 }
 0x4eb   : > { %v1027_v48 = vpop.f32.mrf.mxu1 }
 0x4ec   : > { %v681_v49 = vmul.f32 1.442695, %v678_v47  ;;  %v1036_v58 = vmul.f32 0.35355338, %v1027_v48 }
 0x4ee   : > { %1799 = vpow2.f32 %v681_v49  ;;  %v1039_v1 = vsel %vm537_vm12, %v1036_v58, -inf }
 0x4f1   : > { %v674_v50 = vpop.xlane.xlu1 %673 }
 0x4f2   : > { %v679_v51 = vsub.f32 %v667_v27, %v674_v50 }
 0x4f3   : > { %v1030_v52 = vpop.f32.mrf.mxu1 }
 0x4f4   : > { %v2349_v53 = vpop.eup %1799  ;;  %v683_v54 = vmul.f32 1.442695, %v679_v51  ;;  %v1037_v55 = vmul.f32 0.35355338, %v1030_v52 }
 0x4f5   : > { %v687_v56 = vsel %vm537_vm12, %v2349_v53, 0.0 }
 0x4f6   : > { %1801 = vpow2.f32 %v683_v54  ;;  %688 = vadd.xlane.f32.xlu0 %v687_v56  ;;  %v1042_v57 = vsel %vm537_vm12, %v1037_v55, -inf }
 0x4f7   : > { %1043 = vmax.xlane.f32.xlu2 %v1042_v57 }
 0x4f9   : > { %v677_v59 = vpop.xlane.xlu2 %676 }
 0x4fa   : > { %v680_v60 = vsub.f32 %v668_v32, %v677_v59 }
 0x4fb   : > { %v1033_v61 = vpop.f32.mrf.mxu1 }
 0x4fc   : > { %v2354_v62 = vpop.eup %1801  ;;  %v685_v63 = vmul.f32 1.442695, %v680_v60  ;;  %v1038_v0 = vmul.f32 0.35355338, %v1033_v61 }
 0x4fd   : > { %v690_v3 = vsel %vm537_vm12, %v2354_v62, 0.0 }
 0x4fe   : > { %1803 = vpow2.f32 %v685_v63  ;;  %1040 = vmax.xlane.f32.xlu0 %v1039_v1  ;;  %v1045_v4 = vsel %vm537_vm12, %v1038_v0, -inf }
 0x4ff   : > { %691 = vadd.xlane.f32.xlu2 %v690_v3  ;;  %1046 = vmax.xlane.f32.xlu1 %v1045_v4  ;;  %v746_v4 = vld [vmem:[#allocation5 + $0x8] sm:$0xff] }
 0x500   : > { %771 = vmatpush.msrb.mxu0 %v746_v4 }
 0x501   : > { %v872_v8 = vpop.xlane.xlu1 %871 }
 0x502   : > { %v879_v11 = vsub.f32 %v867_v35, %v872_v8 }
 0x504   : > { %v2360_v5 = vpop.eup %1803  ;;  %v882_v12 = vmul.f32 1.442695, %v879_v11 }
 0x505   : > { %v693_v6 = vsel %vm537_vm12, %v2360_v5, 0.0 }
 0x506   : > { %1805 = vpow2.f32 %v882_v12 }
 0x507   : > { %694 = vadd.xlane.f32.xlu2 %v693_v6 }
 0x509   : > { %v875_v14 = vpop.xlane.xlu0 %874 }
 0x50a   : > { %v880_v15 = vsub.f32 %v868_v38, %v875_v14 }
 0x50c   : > { %v2370_v16 = vpop.eup %1805  ;;  %v884_v17 = vmul.f32 1.442695, %v880_v15 }
 0x50d   : > { %v888_v19 = vsel %vm537_vm12, %v2370_v16, 0.0 }
 0x50e   : > { %1807 = vpow2.f32 %v884_v17 }
 0x512   : > { %702 = vrot.lane.b32.xlu0 %v2239_v13, %s2059_s22 }
 0x514   : > { %v2374_v20 = vpop.eup %1807 }
 0x515   : > { %v891_v21 = vsel %vm537_vm12, %v2374_v20, 0.0 }
 0x518   : > { %1765 = vrot.lane.b32.xlu1 %v2265_v31, %s2059_s22 }
 0x51a   : > { %1770 = vrot.lane.b32.xlu0 %v2265_v31, %s2060_s2 }
 0x51f   : > { %1072 = vrot.lane.b32.xlu2 %v2239_v13, %s2060_s2 }
 0x522   : > { %1775 = vrot.lane.b32.xlu0 %v2265_v31, %s2061_s3  ;;  %v878_v31 = vpop.xlane.xlu2 %877 }
 0x523   : > { %v881_v63 = vsub.f32 %v2339_v41, %v878_v31 }
 0x542   : > { %889 = vadd.xlane.f32.xlu1 %v888_v19 }
 0x54c   : > { %892 = vadd.xlane.f32.xlu0 %v891_v21 }
 0x569   : > { %v689_v22 = vpop.xlane.xlu0 %688 }
 0x56a   : > { %v1044_v23 = vpop.xlane.xlu2 %1043 }
 0x56b   : > { %v1049_v28 = vsub.f32 %v1037_v55, %v1044_v23 }
 0x56d   : > { %v1053_v32 = vmul.f32 1.442695, %v1049_v28 }
 0x571   : > { %v1041_v24 = vpop.xlane.xlu0 %1040 }
 0x572   : > { %v1048_v25 = vsub.f32 %v1036_v58, %v1041_v24  ;;  %v1047_v26 = vpop.xlane.xlu1 %1046  ;;  %v692_v36 = vpop.xlane.xlu2 %691 }
 0x573   : > { %v1050_v27 = vsub.f32 %v1038_v0, %v1047_v26  ;;  %v886_v0 = vmul.f32 1.442695, %v881_v63 }
 0x574   : > { %v1051_v29 = vmul.f32 1.442695, %v1048_v25 }
 0x575   : > { %v1055_v30 = vmul.f32 1.442695, %v1050_v27 }
 0x576   : > { %1809 = vpow2.f32 %v1051_v29  ;;  %v947_v29 = vld [vmem:[#allocation5 + $0x10] sm:$0xff] }
 0x577   : > { %1811 = vpow2.f32 %v1055_v30  ;;  %972 = vmatpush.msra.mxu0 %v947_v29 }
 0x578   : > { %1813 = vpow2.f32 %v1053_v32 }
 0x579   : > { %1815 = vrcp.f32 %v689_v22 }
 0x57a   : > { %v695_v42 = vpop.xlane.xlu2 %694  ;;  %1817 = vrcp.f32 %v692_v36 }
 0x57b   : > { %1819 = vrcp.f32 %v695_v42 }
 0x57c   : > { %v1810_v33 = vpop.eup %1809  ;;  %1821 = vpow2.f32 %v886_v0 }
 0x57d   : > { %v2378_v34 = vpop.eup %1811  ;;  %v1057_v35 = vsel %vm537_vm12, %v1810_v33, 0.0 }
 0x57e   : > { %1058 = vadd.xlane.f32.xlu2 %v1057_v35  ;;  %v1063_v37 = vsel %vm537_vm12, %v2378_v34, 0.0  ;;  %v1814_v38 = vpop.eup %1813 }
 0x57f   : > { %1064 = vadd.xlane.f32.xlu1 %v1063_v37  ;;  %v1060_v40 = vsel %vm537_vm12, %v1814_v38, 0.0  ;;  %v1816_v49 = vpop.eup %1815 }
 0x580   : > { %v699_v54 = vmul.f32 %v1816_v49, %v2349_v53  ;;  %v1818_v57 = vpop.eup %1817  ;;  %v1158_v49 = vperm.slane %v2236_v9, 1 }
 0x581   : > { %v700_v60 = vmul.f32 %v1818_v57, %v2354_v62  ;;  %v1820_v61 = vpop.eup %1819 }
 0x582   : > { %v1073_v55 = vpop.permute.xlu2 %1072  ;;  %v701_v53 = vmul.f32 %v1820_v61, %v2360_v5  ;;  %v1822_v1 = vpop.eup %1821 }
 0x583   : > { %v894_v3 = vsel %vm537_vm12, %v1822_v1, 0.0 }
 0x584   : > { %v703_v39 = vpop.permute.xlu0 %702 }
 0x586   : > { %1061 = vadd.xlane.f32.xlu2 %v1060_v40 }
 0x58a   : > { %v1766_v46 = vpop.permute.xlu1 %1765 }
 0x58b   : > { %v1767_v47 = vunpack.i.l.bf16 %v1766_v46  ;;  %v1768_v51 = vunpack.i.h.bf16 %v1766_v46 }
 0x58c   : > { %v1771_v48 = vpop.permute.xlu0 %1770 }
 0x58d   : > { %v1772_v50 = vunpack.i.l.bf16 %v1771_v48  ;;  %733 = vmatpush.msrb.mxu2 %v1767_v47  ;;  %v1773_v52 = vunpack.i.h.bf16 %v1771_v48 }
 0x58f   : > { %734 = vmatpush.msrb.mxu2 %v1768_v51  ;;  %1103 = vmatpush.msrb.mxu3 %v1772_v50 }
 0x591   : > { %735 = vmatpush.msrb.mxu2 %v703_v39  ;;  %1104 = vmatpush.msrb.mxu3 %v1773_v52 }
 0x592   : > { %1615 = vmatmul.msk.f32.vlgmr.msrb.gmra.mxu2 %vm537_vm12, %v699_v54 }
 0x593   : > { %1105 = vmatpush.msrb.mxu3 %v1073_v55 }
 0x594   : > { %v1776_v56 = vpop.permute.xlu0 %1775 }
 0x595   : > { %v1777_v58 = vunpack.i.l.bf16 %v1776_v56  ;;  %v1778_v59 = vunpack.i.h.bf16 %v1776_v56 }
 0x597   : > { %934 = vmatpush.msra.mxu2 %v1777_v58 }
 0x599   : > { %935 = vmatpush.msra.mxu2 %v1778_v59 }
 0x59a   : > { %1616 = vmatmul.msk.f32.gmra.mxu2 %vm537_vm12, %v700_v60 }
 0x59e   : > { %903 = vrot.lane.b32.xlu2 %v2239_v13, %s2061_s3  ;;  %s349_s3 = sand.u32 1, %s2034_s25  }
 0x59f   : > { %s1660_s10 = smul.u32 24, %s349_s3  ;;  %s1453_s28 = scalar_lea.sflag [#allocation4], %s349_s3 }
 0x5a1   : > { %s351_s13 = scalar_lea.vmem [#allocation10], %s1660_s10 }
 0x5a2   : > { %1617 = vmatmul.msk.f32.gmra.mxu2 %vm537_vm12, %v701_v53  ;;  %s1465_s8 = sshll.u32 %s351_s13, 4  ;;  %s1466_s8 = int_to_ptr.vmem [resolvable:$true] %s1465_s8 }
 0x5b5   : > { %v890_v6 = vpop.xlane.xlu1 %889 }
 0x5bf   : > { %v893_v5 = vpop.xlane.xlu0 %892 }
 0x5c7   : > { %895 = vadd.xlane.f32.xlu2 %v894_v3 }
 0x5f1   : > { %v1059_v62 = vpop.xlane.xlu2 %1058 }
 0x5f2   : > { %1823 = vrcp.f32 %v1059_v62  ;;  %v1065_v41 = vpop.xlane.xlu1 %1064 }
 0x5f3   : > { %1825 = vrcp.f32 %v890_v6 }
 0x5f8   : > { %v1824_v8 = vpop.eup %1823 }
 0x5f9   : > { %v1069_v13 = vmul.f32 %v1824_v8, %v1810_v33  ;;  %v1062_v11 = vpop.xlane.xlu2 %1061  ;;  %v1826_v12 = vpop.eup %1825 }
 0x5fa   : > { %1827 = vrcp.f32 %v1062_v11  ;;  %v900_v15 = vmul.f32 %v1826_v12, %v2370_v16 }
 0x5fb   : > { %1642 = vmatmul.msk.f32.vlgmr.msrb.gmra.mxu3 %vm537_vm12, %v1069_v13  ;;  %1829 = vrcp.f32 %v893_v5 }
 0x5fc   : > { %1831 = vrcp.f32 %v1065_v41 }
 0x600   : > { %v1828_v14 = vpop.eup %1827 }
 0x601   : > { %v904_v17 = vpop.permute.xlu2 %903  ;;  %v1070_v19 = vmul.f32 %v1828_v14, %v1814_v38  ;;  %v1830_v21 = vpop.eup %1829 }
 0x602   : > { %936 = vmatpush.msra.mxu2 %v904_v17  ;;  %v1832_v31 = vpop.eup %1831  ;;  %v901_v22 = vmul.f32 %v1830_v21, %v2374_v20  ;;  %v1116_v20 = vld [vmem:[#allocation5 + $0x18] sm:$0xff]  ;;  %v1230_v21 = vld [vmem:[#allocation7 + $0x10] sm:$0xff] }
 0x603   : > { %1630 = vmatmul.msk.f32.vlgmr.msra.gmra.mxu2 %vm537_vm12, %v900_v15  ;;  %1643 = vmatmul.msk.f32.gmra.mxu3 %vm537_vm12, %v1070_v19  ;;  %v1071_v23 = vmul.f32 %v1832_v31, %v2378_v34  ;;  %v1231_v19 = vld [vmem:[#allocation7 + $0x18] sm:$0xff]  ;;  %v1229_v31 = vld [vmem:[#allocation7 + $0x8] sm:$0xff] }
 0x604   : > { %1141 = vmatpush.msrb.mxu2 %v1116_v20 }
 0x60b   : > { %1631 = vmatmul.msk.f32.gmra.mxu2 %vm537_vm12, %v901_v22  ;;  %1644 = vmatmul.msk.f32.gmra.mxu3 %vm537_vm12, %v1071_v23  ;;  %v1228_v22 = vld [vmem:[#allocation7] sm:$0xff] }
 0x615   : > { %v737_v24 = vpop.f32.mrf.mxu2 }
 0x616   : > { %1618 = vmatmul.msk.f32.vlgmr.msrb.gmra.mxu0 %vm495_vm11, %v737_v24 }
 0x617   : > { %1254 = vmatpush.msrb.mxu0 %v1231_v19  ;;  %v1363_v19 = vperm.slane %v2236_v9, 5 }
 0x619   : > { %1255 = vmatpush.msrb.mxu0 %v1230_v21 }
 0x61b   : > { %1256 = vmatpush.msrb.mxu0 %v1229_v31 }
 0x61d   : > { %v740_v16 = vpop.f32.mrf.mxu2  ;;  %1257 = vmatpush.msrb.mxu0 %v1228_v22 }
 0x61e   : > { %1619 = vmatmul.msk.f32.gmra.mxu0 %vm495_vm11, %v740_v16 }
 0x625   : > { %v743_v25 = vpop.f32.mrf.mxu2 }
 0x626   : > { %1620 = vmatmul.msk.f32.gmra.mxu0 %vm495_vm11, %v743_v25 }
 0x63a   : > { %v896_v26 = vpop.xlane.xlu2 %895 }
 0x63b   : > { %1833 = vrcp.f32 %v896_v26 }
 0x641   : > { %v1834_v27 = vpop.eup %1833 }
 0x642   : > { %v902_v28 = vmul.f32 %v1834_v27, %v1822_v1 }
 0x644   : > { %1632 = vmatmul.msk.f32.gmra.mxu2 %vm537_vm12, %v902_v28 }
 0x67e   : > { %v1107_v30 = vpop.f32.mrf.mxu3 }
 0x67f   : > { %1645 = vmatmul.msk.f32.vlgmr.msrb.gmra.mxu2 %vm495_vm11, %v1107_v30 }
 0x686   : > { %v938_v32 = vpop.f32.mrf.mxu2  ;;  %v1110_v33 = vpop.f32.mrf.mxu3 }
 0x687   : > { %1633 = vmatmul.msk.f32.vlgmr.msra.gmra.mxu0 %vm495_vm11, %v938_v32  ;;  %1646 = vmatmul.msk.f32.gmra.mxu2 %vm495_vm11, %v1110_v33 }
 0x68e   : > { %v941_v34 = vpop.f32.mrf.mxu2  ;;  %v1113_v35 = vpop.f32.mrf.mxu3 }
 0x68f   : > { %1634 = vmatmul.msk.f32.gmra.mxu0 %vm495_vm11, %v941_v34  ;;  %1647 = vmatmul.msk.f32.gmra.mxu2 %vm495_vm11, %v1113_v35 }
 0x693   : > { %v773_v37 = vpop.f32.mrf.mxu0 }
 0x694   : > { %v809_v40 = vadd.f32 %v2343_v43, %v773_v37 }
 0x69b   : > { %v776_v38 = vpop.f32.mrf.mxu0 }
 0x69c   : > { %v812_v51 = vadd.f32 %v2345_v44, %v776_v38 }
 0x6a3   : > { %v779_v39 = vpop.f32.mrf.mxu0 }
 0x6c7   : > { %v944_v36 = vpop.f32.mrf.mxu2 }
 0x6c8   : > { %1635 = vmatmul.msk.f32.gmra.mxu0 %vm495_vm11, %v944_v36  ;;  %vm1410_vm11 = vcmask 523264  }
 0x702   : > { %v1143_v42 = vpop.f32.mrf.mxu2 }
 0x704   : > { %v974_v46 = vpop.f32.mrf.mxu0 }
 0x705   : > { %v983_v47 = vadd.f32 %v974_v46, %v809_v40 }
 0x707   : > { %v1152_v48 = vadd.f32 %v1143_v42, %v983_v47 }
 0x709   : > { %v1155_v50 = vadd.f32 %v1152_v48, %v2207_v2  ;;  %v815_v2 = vadd.f32 %v2347_v45, %v779_v39 }
 0x70a   : > { %v1146_v57 = vpop.f32.mrf.mxu2 }
 0x70b   : > { %v2416_v52 = vadd.f32 %v1158_v49, %v1155_v50 }
 0x70c   : > { %v977_v54 = vpop.f32.mrf.mxu0 }
 0x70d   : > { %v984_v55 = vadd.f32 %v977_v54, %v812_v51  ;;  %v1162_v56 = vsel %vm371_vm0, %v2416_v52, 0.0 }
 0x70e   : > { %1163 = vadd.xlane.f32.xlu1 %v1162_v56 }
 0x70f   : > { %v1153_v43 = vadd.f32 %v1146_v57, %v984_v55 }
 0x711   : > { %v1156_v58 = vadd.f32 %v1153_v43, %v2215_v10 }
 0x712   : > { %v1149_v53 = vpop.f32.mrf.mxu2 }
 0x713   : > { %v2421_v59 = vadd.f32 %v1158_v49, %v1156_v58 }
 0x715   : > { %v1165_v60 = vsel %vm371_vm0, %v2421_v59, 0.0 }
 0x716   : > { %1166 = vadd.xlane.f32.xlu1 %v1165_v60 }
 0x745   : > { %v980_v44 = vpop.f32.mrf.mxu0 }
 0x746   : > { %v985_v61 = vadd.f32 %v980_v44, %v815_v2  ;;  %v1408_v2 = vld [vmem:[%s2527_s5 + $0x38] sm:$0xff]  ;;  %v1406_v44 = vld [vmem:[%s2527_s5 + $0x28] sm:$0xff] }
 0x747   : > { %1428 = vmatpush.msrb.mxu1 %v1408_v2 }
 0x748   : > { %v1154_v63 = vadd.f32 %v1149_v53, %v985_v61  ;;  %v1405_v61 = vld [vmem:[%s2527_s5 + $0x20] sm:$0xff]  ;;  %v1404_v53 = vld [vmem:[%s2527_s5 + $0x18] sm:$0xff] }
 0x74a   : > { %v1157_v0 = vadd.f32 %v1154_v63, %v2209_v7  ;;  %v1403_v63 = vld [vmem:[%s2527_s5 + $0x10] sm:$0xff] }
 0x74c   : > { %v2427_v1 = vadd.f32 %v1158_v49, %v1157_v0  ;;  %v1232_v0 = vperm.slane %v2236_v9, 2 }
 0x74e   : > { %v1168_v3 = vsel %vm371_vm0, %v2427_v1, 0.0 }
 0x74f   : > { %1169 = vadd.xlane.f32.xlu0 %v1168_v3  ;;  %v1291_v3 = vlaneseq }
 0x781   : > { %v1164_v10 = vpop.xlane.xlu1 %1163 }
 0x782   : > { %v1171_v62 = vmul.f32 %v1164_v10, %v2219_v18  ;;  %v1402_v10 = vld [vmem:[%s2527_s5 + $0x8] sm:$0xff] }
 0x784   : > { %v1174_v4 = vsub.f32 %v2416_v52, %v1171_v62  ;;  %v1401_v62 = vld [vmem:[%s2527_s5] sm:$0xff] }
 0x786   : > { %v1177_v6 = vmul.f32 %v1174_v4, %v1174_v4 }
 0x788   : > { %v1180_v45 = vsel %vm371_vm0, %v1177_v6, 0.0 }
 0x789   : > { %1181 = vadd.xlane.f32.xlu1 %v1180_v45  ;;  %v1167_v8 = vpop.xlane.xlu1 %1166  ;;  %v1292_v45 = vshrl.u32 %v1291_v3, 7 }
 0x78a   : > { %v1172_v13 = vmul.f32 %v1167_v8, %v2219_v18 }
 0x78b   : > { %vm1298_vm8 = vcmp.ne.s32.totalorder %v1292_v45, 0  ;;  %vm1304_vm10 = vcmp.ne.s32.totalorder %v1292_v45, 7 }
 0x78c   : > { %v1175_v7 = vsub.f32 %v2421_v59, %v1172_v13 }
 0x78e   : > { %v1178_v11 = vmul.f32 %v1175_v7, %v1175_v7 }
 0x790   : > { %v1183_v5 = vsel %vm371_vm0, %v1178_v11, 0.0 }
 0x791   : > { %1184 = vadd.xlane.f32.xlu0 %v1183_v5 }
 0x7c2   : > { %v1170_v41 = vpop.xlane.xlu0 %1169 }
 0x7c3   : > { %v1173_v12 = vmul.f32 %v1170_v41, %v2219_v18  ;;  %v1347_v41 = vperm.slane %v2236_v9, 4 }
 0x7c5   : > { %v1176_v14 = vsub.f32 %v2427_v1, %v1173_v12 }
 0x7c7   : > { %v1179_v15 = vmul.f32 %v1176_v14, %v1176_v14 }
 0x7c9   : > { %v1186_v17 = vsel %vm371_vm0, %v1179_v15, 0.0 }
 0x7ca   : > { %1187 = vadd.xlane.f32.xlu1 %v1186_v17 }
 0x7fc   : > { %v1182_v23 = vpop.xlane.xlu1 %1181 }
 0x7fd   : > { %v1189_v24 = vmul.f32 %v1182_v23, %v2219_v18 }
 0x7ff   : > { %v1192_v16 = vadd.f32 1e-05, %v1189_v24 }
 0x801   : > { %1835 = vrsqrt.f32 %v1192_v16  ;;  %vm1201_vm14 = vweird.f32 %v1192_v16 }
 0x804   : > { %v1185_v25 = vpop.xlane.xlu0 %1184 }
 0x805   : > { %v1190_v26 = vmul.f32 %v1185_v25, %v2219_v18 }
 0x807   : > { %v1836_v27 = vpop.eup %1835  ;;  %v1193_v28 = vadd.f32 1e-05, %v1190_v26 }
 0x808   : > { %v1196_v20 = vmul.f32 %v1836_v27, %v1192_v16  ;;  %vm1202_vm13 = vweird.f32 %v1836_v27  ;;  %v1370_v16 = vperm.slane %v2236_v9, 6 }
 0x809   : > { %1837 = vrsqrt.f32 %v1193_v28  ;;  %vm1203_vm15 = vmor %vm1201_vm14, %vm1202_vm13  ;;  %vm1211_vm2 = vweird.f32 %v1193_v28 }
 0x80a   : > { %v1197_v29 = vmul.f32 %v1836_v27, %v1196_v20 }
 0x80c   : > { %v1198_v30 = vmul.f32 0.5, %v1197_v29 }
 0x80e   : > { %v1199_v32 = vsub.f32 1.5, %v1198_v30 }
 0x80f   : > { %v1838_v33 = vpop.eup %1837 }
 0x810   : > { %v1200_v34 = vmul.f32 %v1836_v27, %v1199_v32  ;;  %v1206_v35 = vmul.f32 %v1838_v33, %v1193_v28  ;;  %vm1212_vm1 = vweird.f32 %v1838_v33 }
 0x811   : > { %vm1213_vm3 = vmor %vm1211_vm2, %vm1212_vm1 }
 0x812   : > { %v1204_v36 = vsel %vm1203_vm15, %v1836_v27, %v1200_v34  ;;  %v1207_v37 = vmul.f32 %v1838_v33, %v1206_v35 }
 0x813   : > { %v1225_v38 = vmul.f32 %v1204_v36, %v1174_v4 }
 0x814   : > { %v1208_v39 = vmul.f32 0.5, %v1207_v37  ;;  %v1293_v37 = vadd.s32 8, %v1292_v45 }
 0x815   : > { %1648 = vmatmul.msk.f32.vlgmr.msrb.gmra.mxu0 %vm371_vm0, %v1225_v38 }
 0x816   : > { %v1209_v40 = vsub.f32 1.5, %v1208_v39  ;;  %vm1311_vm12 = vcmp.ne.s32.totalorder %v1293_v37, 8  ;;  %v1294_v39 = vadd.s32 16, %v1292_v45  ;;  %vm1317_vm13 = vcmp.ne.s32.totalorder %v1293_v37, 15 }
 0x818   : > { %v1210_v42 = vmul.f32 %v1838_v33, %v1209_v40  ;;  %vm1324_vm14 = vcmp.ne.s32.totalorder %v1294_v39, 16  ;;  %vm1330_vm15 = vcmp.ne.s32.totalorder %v1294_v39, 23 }
 0x81a   : > { %v1214_v46 = vsel %vm1213_vm3, %v1838_v33, %v1210_v42 }
 0x81b   : > { %v1226_v47 = vmul.f32 %v1214_v46, %v1175_v7  ;;  %v1343_v7 = vperm.slane %v2236_v9, 3 }
 0x81d   : > { %1649 = vmatmul.msk.f32.gmra.mxu0 %vm371_vm0, %v1226_v47 }
 0x83d   : > { %v1188_v48 = vpop.xlane.xlu1 %1187 }
 0x83e   : > { %v1191_v49 = vmul.f32 %v1188_v48, %v2219_v18  ;;  %v1407_v18 = vld [vmem:[%s2527_s5 + $0x30] sm:$0xff] }
 0x83f   : > { %1429 = vmatpush.msrb.mxu1 %v1407_v18 }
 0x840   : > { %v1194_v50 = vadd.f32 1e-05, %v1191_v49 }
 0x841   : > { %1430 = vmatpush.msrb.mxu1 %v1406_v44 }
 0x842   : > { %1839 = vrsqrt.f32 %v1194_v50  ;;  %vm1221_vm5 = vweird.f32 %v1194_v50 }
 0x843   : > { %1431 = vmatpush.msrb.mxu1 %v1405_v61 }
 0x845   : > { %1432 = vmatpush.msrb.mxu1 %v1404_v53 }
 0x847   : > { %1433 = vmatpush.msrb.mxu1 %v1403_v63 }
 0x848   : > { %v1840_v51 = vpop.eup %1839 }
 0x849   : > { %v1216_v54 = vmul.f32 %v1840_v51, %v1194_v50  ;;  %vm1222_vm4 = vweird.f32 %v1840_v51  ;;  %1434 = vmatpush.msrb.mxu1 %v1402_v10 }
 0x84a   : > { %vm1223_vm6 = vmor %vm1221_vm5, %vm1222_vm4 }
 0x84b   : > { %v1217_v55 = vmul.f32 %v1840_v51, %v1216_v54  ;;  %1435 = vmatpush.msrb.mxu1 %v1401_v62 }
 0x84d   : > { %v1218_v56 = vmul.f32 0.5, %v1217_v55 }
 0x84f   : > { %v1219_v57 = vsub.f32 1.5, %v1218_v56 }
 0x851   : > { %v1220_v43 = vmul.f32 %v1840_v51, %v1219_v57 }
 0x853   : > { %v1224_v58 = vsel %vm1223_vm6, %v1840_v51, %v1220_v43 }
 0x854   : > { %v1227_v60 = vmul.f32 %v1224_v58, %v1176_v14 }
 0x856   : > { %1650 = vmatmul.msk.f32.gmra.mxu0 %vm371_vm0, %v1227_v60 }
 0x892   : > { %v1259_v4 = vpop.f32.mrf.mxu0 }
 0x893   : > { %v1260_v6 = vadd.f32 %v1259_v4, %v1232_v0 }
 0x895   : > { %v1272_v8 = vrot.slane %v1260_v6, 7  ;;  %v1282_v14 = vrot.slane %v1260_v6, 1  ;;  %v1348_v21 = vmul.f32 %v1347_v41, %v1260_v6 }
 0x897   : > { %v1280_v13 = vsel %vm1271_vm7, 0.0, %v1272_v8 }
 0x898   : > { %v1340_v11 = vsel %vm1298_vm8, %v1280_v13, 0.0 }
 0x899   : > { %v1344_v15 = vmul.f32 %v1343_v7, %v1340_v11 }
 0x89a   : > { %v1262_v5 = vpop.f32.mrf.mxu0 }
 0x89b   : > { %v1263_v12 = vadd.f32 %v1262_v5, %v1232_v0  ;;  %v1351_v23 = vadd.f32 %v1348_v21, %v1344_v15 }
 0x89d   : > { %v1283_v17 = vrot.slane %v1263_v12, 1  ;;  %v1273_v36 = vrot.slane %v1263_v12, 7  ;;  %v1349_v49 = vmul.f32 %v1347_v41, %v1263_v12 }
 0x89f   : > { %v1284_v31 = vsel %vm1281_vm9, %v1282_v14, %v1283_v17  ;;  %v1274_v38 = vsel %vm1271_vm7, %v1272_v8, %v1273_v36 }
 0x8a0   : > { %v1360_v22 = vsel %vm1304_vm10, %v1284_v31, 0.0  ;;  %v1341_v9 = vsel %vm1311_vm12, %v1274_v38, 0.0  ;;  %v1847_v31 = vld [vmem:[#allocation8] sm:$0xff] }
 0x8a1   : > { %v1364_v24 = vmul.f32 %v1363_v19, %v1360_v22  ;;  %v1345_v46 = vmul.f32 %v1343_v7, %v1341_v9  ;;  %v1409_v22 = vperm.slane %v1847_v31, 7 }
 0x8a3   : > { %v1367_v25 = vadd.f32 %v1364_v24, %v1351_v23  ;;  %v1352_v55 = vadd.f32 %v1349_v49, %v1345_v46 }
 0x8a5   : > { %v1371_v26 = vadd.f32 %v1370_v16, %v1367_v25 }
 0x8a7   : > { %v1377_v27 = vmul.f32 0.044715, %v1371_v26  ;;  %v1374_v33 = vmul.f32 0.5, %v1371_v26 }
 0x8a9   : > { %v1380_v28 = vmul.f32 %v1377_v27, %v1371_v26 }
 0x8ab   : > { %v1383_v20 = vmul.f32 %v1380_v28, %v1371_v26 }
 0x8ad   : > { %v1386_v29 = vadd.f32 %v1383_v20, %v1371_v26 }
 0x8af   : > { %v1389_v30 = vmul.f32 0.7978846, %v1386_v29 }
 0x8b1   : > { %1841 = vtanh.f32 %v1389_v30 }
 0x8b7   : > { %v1842_v32 = vpop.eup %1841 }
 0x8b8   : > { %v1395_v34 = vadd.f32 1.0, %v1842_v32 }
 0x8ba   : > { %v1398_v35 = vmul.f32 %v1395_v34, %v1374_v33 }
 0x8bc   : > { %1651 = vmatmul.msk.f32.vlgmr.msrb.gmra.mxu1 %vm1410_vm11, %v1398_v35 }
 0x8d3   : > { %v1265_v40 = vpop.f32.mrf.mxu0 }
 0x8d4   : > { %v1266_v42 = vadd.f32 %v1265_v40, %v1232_v0 }
 0x8d6   : > { %v1275_v47 = vrot.slane %v1266_v42, 7  ;;  %v1285_v48 = vrot.slane %v1266_v42, 1  ;;  %v1350_v60 = vmul.f32 %v1347_v41, %v1266_v42 }
 0x8d8   : > { %v1276_v50 = vsel %vm1271_vm7, %v1273_v36, %v1275_v47  ;;  %v1286_v51 = vsel %vm1281_vm9, %v1283_v17, %v1285_v48  ;;  %v1290_v54 = vsel %vm1281_vm9, %v1285_v48, 0.0 }
 0x8d9   : > { %v1342_v56 = vsel %vm1324_vm14, %v1276_v50, 0.0  ;;  %v1361_v57 = vsel %vm1317_vm13, %v1286_v51, 0.0  ;;  %v1362_v43 = vsel %vm1330_vm15, %v1290_v54, 0.0 }
 0x8da   : > { %v1346_v58 = vmul.f32 %v1343_v7, %v1342_v56  ;;  %v1365_v2 = vmul.f32 %v1363_v19, %v1361_v57  ;;  %v1366_v18 = vmul.f32 %v1363_v19, %v1362_v43 }
 0x8dc   : > { %v1353_v44 = vadd.f32 %v1350_v60, %v1346_v58  ;;  %v1368_v61 = vadd.f32 %v1365_v2, %v1352_v55 }
 0x8de   : > { %v1369_v53 = vadd.f32 %v1366_v18, %v1353_v44  ;;  %v1372_v63 = vadd.f32 %v1370_v16, %v1368_v61 }
 0x8e0   : > { %v1373_v0 = vadd.f32 %v1370_v16, %v1369_v53  ;;  %v1378_v3 = vmul.f32 0.044715, %v1372_v63  ;;  %v1375_v41 = vmul.f32 0.5, %v1372_v63 }
 0x8e2   : > { %v1381_v10 = vmul.f32 %v1378_v3, %v1372_v63  ;;  %v1379_v62 = vmul.f32 0.044715, %v1373_v0  ;;  %v1376_v19 = vmul.f32 0.5, %v1373_v0 }
 0x8e4   : > { %v1384_v4 = vmul.f32 %v1381_v10, %v1372_v63  ;;  %v1382_v6 = vmul.f32 %v1379_v62, %v1373_v0 }
 0x8e6   : > { %v1387_v45 = vadd.f32 %v1384_v4, %v1372_v63  ;;  %v1385_v8 = vmul.f32 %v1382_v6, %v1373_v0 }
 0x8e8   : > { %v1390_v13 = vmul.f32 0.7978846, %v1387_v45  ;;  %v1388_v11 = vadd.f32 %v1385_v8, %v1373_v0 }
 0x8ea   : > { %1843 = vtanh.f32 %v1390_v13  ;;  %v1391_v7 = vmul.f32 0.7978846, %v1388_v11 }
 0x8ec   : > { %1845 = vtanh.f32 %v1391_v7 }
 0x8f0   : > { %v1844_v5 = vpop.eup %1843 }
 0x8f1   : > { %v1396_v12 = vadd.f32 1.0, %v1844_v5 }
 0x8f2   : > { %v1846_v15 = vpop.eup %1845 }
 0x8f3   : > { %v1399_v14 = vmul.f32 %v1396_v12, %v1375_v41  ;;  %v1397_v17 = vadd.f32 1.0, %v1846_v15 }
 0x8f5   : > { %1652 = vmatmul.msk.f32.gmra.mxu1 %vm1410_vm11, %v1399_v14  ;;  %v1400_v21 = vmul.f32 %v1397_v17, %v1376_v19 }
 0x8fd   : > { %1653 = vmatmul.msk.f32.gmra.mxu1 %vm1410_vm11, %v1400_v21 }
 0x939   : > { %v1437_v23 = vpop.f32.mrf.mxu1 }
 0x93a   : > { %v1438_v24 = vadd.f32 %v1437_v23, %v1409_v22 }
 0x93c   : > { %v1446_v16 = vadd.f32 %v1438_v24, %v2416_v52 }
 0x93e   : > { %1449 = vst.msk [vmem:[%s351_s13] sm:$0xff] %vm371_vm0, %v1446_v16 }
 0x972   : > { %v1440_v25 = vpop.f32.mrf.mxu1 }
 0x973   : > { %v1441_v26 = vadd.f32 %v1440_v25, %v1409_v22 }
 0x975   : > { %v1447_v27 = vadd.f32 %v1441_v26, %v2421_v59 }
 0x977   : > { %1450 = vst.msk [vmem:[%s351_s13 + $0x8] sm:$0xff] %vm371_vm0, %v1447_v27 }
 0x97a   : > { %v1443_v28 = vpop.f32.mrf.mxu1 }
 0x97b   : > { %v1444_v20 = vadd.f32 %v1443_v28, %v1409_v22 }
 0x97d   : > { %v1448_v52 = vadd.f32 %v1444_v20, %v2427_v1 }
 0x97f   : > { %1451 = vst.msk [vmem:[%s351_s13 + $0x10] sm:$0xff] %vm371_vm0, %v1448_v52 }
 0x980   : > { %1995 = shalt.err (!%p1992_p8)
}
 0x981   : > { %s2062_s2 = smov 128   ;;  %s2063_s3 = smov 8  }
 0x982   : > { %1679 = dma.vmem_to_hbm [thread:$0]  (%p2142_p5), %s1466_s8, 384, %s1468_s9, %s1453_s28, %s2062_s2, %s2062_s2, %s2063_s3  }
 0x983 PF: > { %p1706_p9 = scmp.ge.s32.totalorder %s2042_s27, 2  ;;  %s1482_s10 = sand.u32 1, %s2030_s24  }
 0x984   : > { %s1483_s13 = scalar_lea.sflag [#allocation4], %s1482_s10 }
 0x985   : > { %p1695_p10 = pnand %p1706_p9, %p2146_p6 }
 0x987   : > { %p1696_p11 = pneg %p1695_p10 }
 0x989   : > { %2025 = dma.done.wait (%p1696_p11), %s1483_s13, 384  }
 0x98a   : > { %2027 = vsyncadd (%p1696_p11), %s1483_s13, 4294966912  ;;  %s2539_s19 = sld [smem:[#allocation15_spill]]  ;;  %p20_p12 = scmp.ge.s32.totalorder %s2129_s30, 4  }
 0x98b   : > { %s2540_s24 = smov %s2034_s25  ;;  %s2541_s25 = smov %s2038_s26 }
 0x98c   : > { %s2543_s27 = smov %s2129_s30  ;;  %22 = sbr.rel (!%p20_p12) target bundleno = 9 (0x9), region = 103 }
 0x990   : > { %s2542_s26 = smov %s2539_s19 }
 0x991   :  { %1489 = vsyncpa [#allocation3], 1 }
 0x992   :  { %1491 = vsyncpa [#allocation3 + $0x1], 1 }
 0x993   :  { %1492 = vsyncpa [#allocation6], 1 }
 0x994   :  { %1493 = vsyncpa [#allocation9], 1 }
 0x995   :  { %1494 = vsyncpa [#allocation4], 1 }
 0x996   :  { %1496 = vsyncpa [#allocation4 + $0x1], 1 }

</bundles_post_ra>
